<compile_context>
chip_gen: v6e
topology: v6e:2x2x1
jax: 0.10.0
libtpu: 0.0.40
codegen_flags: <defaults>
</compile_context>

<pallas_src>
import jax
import jax.numpy as jnp
from jax import lax
from jax.experimental import pallas as pl
from jax.experimental.pallas import tpu as pltpu


def _round_up(x, m):
    return (x + m - 1) // m * m


def _cdiv(a, b):
    return (a + b - 1) // b


def _bn_fold(g, b, m, v, eps=1e-5):
    s = g / jnp.sqrt(v + eps)
    return s, b - m * s


# --------------------------------------------------------------------------
# Fused Pallas kernel
# --------------------------------------------------------------------------

def conve_fused_kernel(img_ref, wconv_ref, bconv_ref, wfc_ref, bfc_ref,
                       e2t_ref, out_ref):
    # One grid step = (batch b, N2-tile j).
    #   img_ref  : (T, H*W)      bf16 raw stacked e1/rel image rows of batch b
    #   wconv_ref: (H*W, P*C)    bf16 conv-as-Toeplitz weights (bn0/bn1 folded)
    #   bconv_ref: (1, P*C)      f32 conv bias + bn0/bn1 shift, folded
    #   wfc_ref  : (P*C, D)      bf16 fc weights (NCHW permutation + bn2 folded)
    #   bfc_ref  : (1, D)        f32 fc bias + bn2 shift, folded
    #   e2t_ref  : (1, D, TILE)  bf16 pre-transposed candidate entity tile
    #   out_ref  : (T, TILE)     f32 lane-dense score tile
    # h is recomputed per tile (negligible FLOPs) so there is no cross-iteration
    # state and both grid axes can be "parallel".
    feat = jnp.dot(img_ref[...], wconv_ref[...],
                   preferred_element_type=jnp.float32)           # conv -> (T, P*C)
    feat = jnp.maximum(feat + bconv_ref[...], 0.0)               # bn0/bn1 + relu
    h = jnp.dot(feat.astype(jnp.bfloat16), wfc_ref[...],
                preferred_element_type=jnp.float32)              # fc   -> (T, D)
    h = jnp.maximum(h + bfc_ref[...], 0.0)                       # bn2 + relu
    # scores = h @ e2^T (torch.bmm); e2 already transposed -> lane-dense RHS.
    out_ref[...] = jnp.dot(h.astype(jnp.bfloat16), e2t_ref[0],
                           preferred_element_type=jnp.float32)


# --------------------------------------------------------------------------
# ConvE forward (param folding / layout glue in plain JAX, hot path in Pallas)
# --------------------------------------------------------------------------

def conve_forward(e1, rel, e2, params, cfg, tile_n2=4096):
    B, T, D = rel.shape
    d1, d2 = cfg["emb_dim1"], cfg["emb_dim2"]
    KH, KW = cfg["kernel_size"]
    C = cfg["filter_channels"]
    H, W = 2 * d1, d2
    HW = H * W
    Hout, Wout = H - KH + 1, W - KW + 1            # stride=1, padding=0
    P = Hout * Wout
    F = P * C
    N2 = e2.shape[1]

    # ---- parameter folding (done once per call; cache these in practice) ----
    s0, t0 = _bn_fold(params["bn0_g"], params["bn0_b"], params["bn0_m"], params["bn0_v"])
    s1, t1 = _bn_fold(params["bn1_g"], params["bn1_b"], params["bn1_m"], params["bn1_v"])
    s2, t2 = _bn_fold(params["bn2_g"], params["bn2_b"], params["bn2_m"], params["bn2_v"])

    conv_w = params["conv_w"].reshape(C, KH * KW)                  # (C, K)

    # Conv as one dense matmul on the raw image:
    #   wbig[q, p*C + c] = s0 * s1[c] * conv_w[c, k]  iff pixel q is tap k of patch p.
    eye_imgs = jnp.eye(HW, dtype=jnp.float32).reshape(HW, H, W)
    patches_eye = jnp.stack(
        [eye_imgs[:, kh:kh + Hout, kw:kw + Wout]
         for kh in range(KH) for kw in range(KW)],
        axis=-1).reshape(HW, P, KH * KW)                           # (HW, P, K)
    w_k_c = (s0[0] * conv_w).T                                     # (K, C), bn0 scale folded
    wbig = jnp.einsum("qpk,kc->qpc", patches_eye, w_k_c)
    wbig = (wbig * s1[None, None, :]).reshape(HW, F).astype(jnp.bfloat16)

    bconv_c = (params["conv_b"] + t0[0] * conv_w.sum(-1)) * s1 + t1    # (C,)
    bconv = jnp.tile(bconv_c, P)[None, :].astype(jnp.float32)     # (1, F), index p*C + c

    # fc weights: fold bn2 scale and the NCHW (c-major) -> (p-major) flatten
    # permutation into the weight rows.
    wfc = jnp.transpose(params["fc_w"].reshape(D, C, P), (2, 1, 0)).reshape(F, D)
    wfc = (wfc * s2[None, :]).astype(jnp.bfloat16)
    bfc = (params["fc_b"] * s2 + t2)[None, :].astype(jnp.float32)  # (1, D)

    # ---- activations: e1.repeat + rel reshape + cat on H, flattened ----
    T_pad = _round_up(T, 8)                        # sublane tiling needs rows % 8 == 0
    rel_p = rel if T_pad == T else jnp.pad(rel, ((0, 0), (0, T_pad - T), (0, 0)))
    e1_img = jnp.broadcast_to(e1, (B, T_pad, D)).reshape(B * T_pad, d1, d2)
    rel_img = rel_p.reshape(B * T_pad, d1, d2)
    img = jnp.concatenate([e1_img, rel_img], axis=1).reshape(B * T_pad, HW)
    img = img.astype(jnp.bfloat16)

    # ---- e2: pre-transposed (B, D, N2_pad) bf16, lane-dense along N2 ----
    # (In production the entity table would be stored in this layout, like the
    #  folded weights, so the transpose/cast is not on the hot path.)
    n2_128 = _round_up(N2, 128)
    nt = max(1, _cdiv(n2_128, tile_n2))
    tile = _round_up(_cdiv(n2_128, nt), 128)       # minimal padding overshoot
    n2_pad = nt * tile
    e2t = jnp.swapaxes(e2, 1, 2).astype(jnp.bfloat16)              # (B, D, N2)
    if n2_pad != N2:
        e2t = jnp.pad(e2t, ((0, 0), (0, 0), (0, n2_pad - N2)))

    # Explicit VMEM budget: single-buffered resident weights + double-buffered
    # img / e2-tile / out-tile, with 2x headroom, clamped to [32 MiB, 64 MiB].
    vmem_est = (2 * T_pad * HW * 2
                + HW * F * 2 + F * 4 + F * D * 2 + D * 4
                + 2 * D * tile * 2
                + 2 * T_pad * tile * 4)
    vmem_limit = int(min(max(2 * vmem_est, 32 * 1024 * 1024), 64 * 1024 * 1024))

    def _run(single_buffer_weights):
        if single_buffer_weights:
            def res_spec(shape):   # resident weights: no double-buffer
                return pl.BlockSpec(shape, lambda b, j: (0,) * len(shape),
                                    pipeline_mode=pl.Buffered(1))
        else:
            def res_spec(shape):
                return pl.BlockSpec(shape, lambda b, j: (0,) * len(shape))

        return jax.block_until_ready(pl.pallas_call(
            conve_fused_kernel,
            out_shape=jax.ShapeDtypeStruct((B * T_pad, n2_pad), jnp.float32),
            grid_spec=pltpu.PrefetchScalarGridSpec(
                num_scalar_prefetch=0,
                grid=(B, nt),
                in_specs=[
                    pl.BlockSpec((T_pad, HW), lambda b, j: (b, 0)),   # image rows of batch b
                    res_spec((HW, F)),                                 # resident weights
                    res_spec((1, F)),
                    res_spec((F, D)),
                    res_spec((1, D)),
                    # e2 tile: lane-dense (D on sublanes, N2 tile on lanes).
                    # On v5e, pipeline_mode=pl.Buffered(3) here hides DMA latency.
                    pl.BlockSpec((1, D, tile), lambda b, j: (b, 0, j)),
                ],
                out_specs=pl.BlockSpec((T_pad, tile), lambda b, j: (b, j)),
            ),
            compiler_params=pltpu.CompilerParams(
                dimension_semantics=("parallel", "parallel"),
                vmem_limit_bytes=vmem_limit),
        )(img, wbig, bconv, wfc, bfc, e2t))

    try:
        out2d = _run(True)
    except Exception:
        # Fallback if this jax build rejects single-buffering via pipeline_mode.
        out2d = _run(False)

    out3d = out2d.reshape(B, T_pad, n2_pad)
    if T_pad != T or n2_pad != N2:
        # Only sliced when padding was actually added (avoid an extra HBM pass).
        out3d = out3d[:, :T, :N2]
    return out3d


# --------------------------------------------------------------------------
# Plain-JAX reference (mirrors the PyTorch forward, eval mode)
# --------------------------------------------------------------------------

def conve_reference(e1, rel, e2, params, cfg, eps=1e-5):
    B, T, D = rel.shape
    d1, d2 = cfg["emb_dim1"], cfg["emb_dim2"]
    e1_img = jnp.broadcast_to(e1, (B, T, D)).reshape(B * T, 1, d1, d2)
    rel_img = rel.reshape(B * T, 1, d1, d2)
    x = jnp.concatenate([e1_img, rel_img], axis=2)

    def bn(x, g, b, m, v):
        sh = [1] * x.ndim
        sh[1] = -1
        return (x - m.reshape(sh)) / jnp.sqrt(v.reshape(sh) + eps) * g.reshape(sh) + b.reshape(sh)

    x = bn(x, params["bn0_g"], params["bn0_b"], params["bn0_m"], params["bn0_v"])
    y = lax.conv_general_dilated(x, params["conv_w"], (1, 1), "VALID",
                                 dimension_numbers=("NCHW", "OIHW", "NCHW"),
                                 precision=lax.Precision.HIGHEST)
    y = y + params["conv_b"][None, :, None, None]
    y = bn(y, params["bn1_g"], params["bn1_b"], params["bn1_m"], params["bn1_v"])
    y = jnp.maximum(y, 0.0)
    y = y.reshape(y.shape[0], -1)
    h = jnp.dot(y, params["fc_w"].T, precision=lax.Precision.HIGHEST) + params["fc_b"]
    h = (h - params["bn2_m"]) / jnp.sqrt(params["bn2_v"] + eps) * params["bn2_g"] + params["bn2_b"]
    h = jnp.maximum(h, 0.0)
    h = h.reshape(B, T, D)
    return jnp.einsum("btd,bnd->btn", h, e2, precision=lax.Precision.HIGHEST)


# --------------------------------------------------------------------------
# Main
# --------------------------------------------------------------------------

if __name__ == "__main__":
    # args: embedding_dim=32, embedding_shape1=4, kernel_size=(3,3),
    #       filter_channels=32 (matches the hard-coded BatchNorm2d(32)),
    #       stride=1, padding=0, use_bias=True, dropouts inactive (eval).
    cfg = dict(embedding_dim=32, emb_dim1=4, emb_dim2=8, kernel_size=(3, 3),
               filter_channels=32)
    D = cfg["embedding_dim"]
    d1, d2 = cfg["emb_dim1"], cfg["emb_dim2"]
    KH, KW = cfg["kernel_size"]
    C = cfg["filter_channels"]
    Hout, Wout = 2 * d1 - KH + 1, d2 - KW + 1
    F = Hout * Wout * C                          # fc input size (1152)

    B, T, N2 = 2, 8, 16                          # batch, num_tokens, candidate entities

    key = jax.random.PRNGKey(0)
    ks = jax.random.split(key, 16)

    e1 = jax.random.normal(ks[0], (B, 1, D), jnp.float32) * 0.1
    rel = jax.random.normal(ks[1], (B, T, D), jnp.float32) * 0.1
    e2 = jax.random.normal(ks[2], (B, N2, D), jnp.float32) * 0.1

    params = {
        "conv_w": jax.random.normal(ks[3], (C, 1, KH, KW), jnp.float32) * 0.1,
        "conv_b": jax.random.normal(ks[4], (C,), jnp.float32) * 0.05,
        "fc_w": jax.random.normal(ks[5], (D, F), jnp.float32) * 0.05,
        "fc_b": jax.random.normal(ks[6], (D,), jnp.float32) * 0.05,
        "bn0_g": jax.random.uniform(ks[7], (1,), jnp.float32, 0.5, 1.5),
        "bn0_b": jax.random.normal(ks[8], (1,), jnp.float32) * 0.1,
        "bn0_m": jax.random.normal(ks[9], (1,), jnp.float32) * 0.1,
        "bn0_v": jax.random.uniform(ks[10], (1,), jnp.float32, 0.5, 1.5),
        "bn1_g": jax.random.uniform(ks[11], (C,), jnp.float32, 0.5, 1.5),
        "bn1_b": jax.random.normal(ks[12], (C,), jnp.float32) * 0.1,
        "bn1_m": jax.random.normal(ks[13], (C,), jnp.float32) * 0.1,
        "bn1_v": jax.random.uniform(ks[14], (C,), jnp.float32, 0.5, 1.5),
        "bn2_g": jax.random.uniform(ks[15], (D,), jnp.float32, 0.5, 1.5),
        "bn2_b": jax.random.normal(ks[8], (D,), jnp.float32) * 0.1,
        "bn2_m": jax.random.normal(ks[9], (D,), jnp.float32) * 0.1,
        "bn2_v": jax.random.uniform(ks[10], (D,), jnp.float32, 0.5, 1.5),
    }

    pred = conve_forward(e1, rel, e2, params, cfg)
    pred = jax.block_until_ready(pred)

    ref = conve_reference(e1, rel, e2, params, cfg)
    assert pred.shape == (B, T, N2), pred.shape
    # bf16 MXU inputs vs f32 HIGHEST-precision reference -> loose abs tolerance.
    err = float(jnp.max(jnp.abs(pred - ref)))
    assert err < 2e-2, err

    print("KERNEL_OK")
</pallas_src>

<mosaic_0001>
module attributes {stable_mosaic.version = 11 : i64} {
  func.func @conve_fused_kernel(%arg0: i32, %arg1: i32, %arg2: memref<8x64xbf16, #tpu.memory_space<vmem>>, %arg3: memref<64x1152xbf16, #tpu.memory_space<vmem>>, %arg4: memref<1x1152xf32, #tpu.memory_space<vmem>>, %arg5: memref<1152x32xbf16, #tpu.memory_space<vmem>>, %arg6: memref<1x32xf32, #tpu.memory_space<vmem>>, %arg7: memref<1x32x128xbf16, #tpu.memory_space<vmem>>, %arg8: memref<8x128xf32, #tpu.memory_space<vmem>>) attributes {dimension_semantics = [#tpu.dimension_semantics<parallel>, #tpu.dimension_semantics<parallel>], iteration_bounds = array<i64: 2, 1>, scalar_prefetch = 0 : i64, scratch_operands = 0 : i64, tpu.core_type = #tpu.core_type<tc>, window_params = [{transform_indices = @transform_0, window_bounds = array<i64: 8, 64>}, {pipeline_mode = #tpu.pipeline_mode<synchronous>, transform_indices = @transform_1, window_bounds = array<i64: 64, 1152>}, {pipeline_mode = #tpu.pipeline_mode<synchronous>, transform_indices = @transform_2, window_bounds = array<i64: 1, 1152>}, {pipeline_mode = #tpu.pipeline_mode<synchronous>, transform_indices = @transform_3, window_bounds = array<i64: 1152, 32>}, {pipeline_mode = #tpu.pipeline_mode<synchronous>, transform_indices = @transform_4, window_bounds = array<i64: 1, 32>}, {transform_indices = @transform_5, window_bounds = array<i64: 1, 32, 128>}, {transform_indices = @transform_6, window_bounds = array<i64: 8, 128>}]} {
    %c0 = arith.constant 0 : index
    %c0_0 = arith.constant 0 : index
    %0 = vector.load %arg2[%c0, %c0_0] : memref<8x64xbf16, #tpu.memory_space<vmem>>, vector<8x64xbf16>
    %c0_1 = arith.constant 0 : index
    %c0_2 = arith.constant 0 : index
    %1 = vector.load %arg3[%c0_1, %c0_2] : memref<64x1152xbf16, #tpu.memory_space<vmem>>, vector<64x1152xbf16>
    %cst = arith.constant dense<0.000000e+00> : vector<8x1152xf32>
    %2 = tpu.matmul %0, %1, %cst {dimension_numbers = #tpu.dot_dimension_numbers<[1], [0], [0], [1], [0, 0, 1, 1], [], []>} : vector<8x64xbf16>, vector<64x1152xbf16>, vector<8x1152xf32> -> vector<8x1152xf32>
    %c0_3 = arith.constant 0 : index
    %c0_4 = arith.constant 0 : index
    %3 = vector.load %arg4[%c0_3, %c0_4] : memref<1x1152xf32, #tpu.memory_space<vmem>>, vector<1x1152xf32>
    %4 = vector.broadcast %3 : vector<1x1152xf32> to vector<8x1152xf32>
    %5 = arith.addf %2, %4 : vector<8x1152xf32>
    %cst_5 = arith.constant 0.000000e+00 : f32
    %6 = vector.broadcast %cst_5 : f32 to vector<8x1152xf32>
    %7 = arith.maximumf %5, %6 : vector<8x1152xf32>
    %8 = arith.truncf %7 : vector<8x1152xf32> to vector<8x1152xbf16>
    %c0_6 = arith.constant 0 : index
    %c0_7 = arith.constant 0 : index
    %9 = vector.load %arg5[%c0_6, %c0_7] : memref<1152x32xbf16, #tpu.memory_space<vmem>>, vector<1152x32xbf16>
    %cst_8 = arith.constant dense<0.000000e+00> : vector<8x32xf32>
    %10 = tpu.matmul %8, %9, %cst_8 {dimension_numbers = #tpu.dot_dimension_numbers<[1], [0], [0], [1], [0, 0, 1, 1], [], []>} : vector<8x1152xbf16>, vector<1152x32xbf16>, vector<8x32xf32> -> vector<8x32xf32>
    %c0_9 = arith.constant 0 : index
    %c0_10 = arith.constant 0 : index
    %11 = vector.load %arg6[%c0_9, %c0_10] : memref<1x32xf32, #tpu.memory_space<vmem>>, vector<1x32xf32>
    %12 = vector.broadcast %11 : vector<1x32xf32> to vector<8x32xf32>
    %13 = arith.addf %10, %12 : vector<8x32xf32>
    %cst_11 = arith.constant 0.000000e+00 : f32
    %14 = vector.broadcast %cst_11 : f32 to vector<8x32xf32>
    %15 = arith.maximumf %13, %14 : vector<8x32xf32>
    %16 = arith.truncf %15 : vector<8x32xf32> to vector<8x32xbf16>
    %c0_12 = arith.constant 0 : index
    %c0_13 = arith.constant 0 : index
    %c0_14 = arith.constant 0 : index
    %17 = vector.load %arg7[%c0_12, %c0_13, %c0_14] : memref<1x32x128xbf16, #tpu.memory_space<vmem>>, vector<1x32x128xbf16>
    %18 = vector.shape_cast %17 : vector<1x32x128xbf16> to vector<32x128xbf16>
    %cst_15 = arith.constant dense<0.000000e+00> : vector<8x128xf32>
    %19 = tpu.matmul %16, %18, %cst_15 {dimension_numbers = #tpu.dot_dimension_numbers<[1], [0], [0], [1], [0, 0, 1, 1], [], []>} : vector<8x32xbf16>, vector<32x128xbf16>, vector<8x128xf32> -> vector<8x128xf32>
    %c0_16 = arith.constant 0 : index
    %c0_17 = arith.constant 0 : index
    %20 = vector.load %arg8[%c0_16, %c0_17] : memref<8x128xf32, #tpu.memory_space<vmem>>, vector<8x128xf32>
    tpu.vector_store %arg8[%c0_16, %c0_17], %19 {strides = array<i32>} : memref<8x128xf32, #tpu.memory_space<vmem>>, vector<8x128xf32>,
    return
  }
  func.func @transform_0(%arg0: i32, %arg1: i32) -> (i32, i32) {
    %c0_i32 = arith.constant 0 : i32
    %c0_i32_0 = arith.constant 0 : i32
    return %arg0, %c0_i32 : i32, i32
  }
  func.func @transform_1(%arg0: i32, %arg1: i32) -> (i32, i32) {
    %c0_i32 = arith.constant 0 : i32
    %c0_i32_0 = arith.constant 0 : i32
    %c0_i32_1 = arith.constant 0 : i32
    return %c0_i32, %c0_i32_0 : i32, i32
  }
  func.func @transform_2(%arg0: i32, %arg1: i32) -> (i32, i32) {
    %c0_i32 = arith.constant 0 : i32
    %c0_i32_0 = arith.constant 0 : i32
    %c0_i32_1 = arith.constant 0 : i32
    return %c0_i32, %c0_i32_0 : i32, i32
  }
  func.func @transform_3(%arg0: i32, %arg1: i32) -> (i32, i32) {
    %c0_i32 = arith.constant 0 : i32
    %c0_i32_0 = arith.constant 0 : i32
    %c0_i32_1 = arith.constant 0 : i32
    return %c0_i32, %c0_i32_0 : i32, i32
  }
  func.func @transform_4(%arg0: i32, %arg1: i32) -> (i32, i32) {
    %c0_i32 = arith.constant 0 : i32
    %c0_i32_0 = arith.constant 0 : i32
    %c0_i32_1 = arith.constant 0 : i32
    return %c0_i32, %c0_i32_0 : i32, i32
  }
  func.func @transform_5(%arg0: i32, %arg1: i32) -> (i32, i32, i32) {
    %c0_i32 = arith.constant 0 : i32
    %c0_i32_0 = arith.constant 0 : i32
    return %arg0, %c0_i32, %arg1 : i32, i32, i32
  }
  func.func @transform_6(%arg0: i32, %arg1: i32) -> (i32, i32) {
    %c0_i32 = arith.constant 0 : i32
    return %arg0, %arg1 : i32, i32
  }
}

module attributes {stable_mosaic.version = 11 : i64} {
  func.func @conve_fused_kernel(%arg0: i32, %arg1: i32, %arg2: memref<8x64xbf16, #tpu.memory_space<vmem>>, %arg3: memref<64x1152xbf16, #tpu.memory_space<vmem>>, %arg4: memref<1x1152xf32, #tpu.memory_space<vmem>>, %arg5: memref<1152x32xbf16, #tpu.memory_space<vmem>>, %arg6: memref<1x32xf32, #tpu.memory_space<vmem>>, %arg7: memref<1x32x128xbf16, #tpu.memory_space<vmem>>, %arg8: memref<8x128xf32, #tpu.memory_space<vmem>>) attributes {dimension_semantics = [#tpu.dimension_semantics<parallel>, #tpu.dimension_semantics<parallel>], iteration_bounds = array<i64: 2, 1>, scalar_prefetch = 0 : i64, scratch_operands = 0 : i64, tpu.core_type = #tpu.core_type<tc>, window_params = [{transform_indices = @transform_0, window_bounds = array<i64: 8, 64>}, {pipeline_mode = #tpu.pipeline_mode<synchronous>, transform_indices = @transform_1, window_bounds = array<i64: 64, 1152>}, {pipeline_mode = #tpu.pipeline_mode<synchronous>, transform_indices = @transform_2, window_bounds = array<i64: 1, 1152>}, {pipeline_mode = #tpu.pipeline_mode<synchronous>, transform_indices = @transform_3, window_bounds = array<i64: 1152, 32>}, {pipeline_mode = #tpu.pipeline_mode<synchronous>, transform_indices = @transform_4, window_bounds = array<i64: 1, 32>}, {transform_indices = @transform_5, window_bounds = array<i64: 1, 32, 128>}, {transform_indices = @transform_6, window_bounds = array<i64: 8, 128>}]} {
    %c0 = arith.constant 0 : index
    %c0_0 = arith.constant 0 : index
    %0 = vector.load %arg2[%c0, %c0_0] : memref<8x64xbf16, #tpu.memory_space<vmem>>, vector<8x64xbf16>
    %c0_1 = arith.constant 0 : index
    %c0_2 = arith.constant 0 : index
    %1 = vector.load %arg3[%c0_1, %c0_2] : memref<64x1152xbf16, #tpu.memory_space<vmem>>, vector<64x1152xbf16>
    %cst = arith.constant dense<0.000000e+00> : vector<8x1152xf32>
    %2 = tpu.matmul %0, %1, %cst {dimension_numbers = #tpu.dot_dimension_numbers<[1], [0], [0], [1], [0, 0, 1, 1], [], []>} : vector<8x64xbf16>, vector<64x1152xbf16>, vector<8x1152xf32> -> vector<8x1152xf32>
    %c0_3 = arith.constant 0 : index
    %c0_4 = arith.constant 0 : index
    %3 = vector.load %arg4[%c0_3, %c0_4] : memref<1x1152xf32, #tpu.memory_space<vmem>>, vector<1x1152xf32>
    %4 = vector.broadcast %3 : vector<1x1152xf32> to vector<8x1152xf32>
    %5 = arith.addf %2, %4 : vector<8x1152xf32>
    %cst_5 = arith.constant 0.000000e+00 : f32
    %6 = vector.broadcast %cst_5 : f32 to vector<8x1152xf32>
    %7 = arith.maximumf %5, %6 : vector<8x1152xf32>
    %8 = arith.truncf %7 : vector<8x1152xf32> to vector<8x1152xbf16>
    %c0_6 = arith.constant 0 : index
    %c0_7 = arith.constant 0 : index
    %9 = vector.load %arg5[%c0_6, %c0_7] : memref<1152x32xbf16, #tpu.memory_space<vmem>>, vector<1152x32xbf16>
    %cst_8 = arith.constant dense<0.000000e+00> : vector<8x32xf32>
    %10 = tpu.matmul %8, %9, %cst_8 {dimension_numbers = #tpu.dot_dimension_numbers<[1], [0], [0], [1], [0, 0, 1, 1], [], []>} : vector<8x1152xbf16>, vector<1152x32xbf16>, vector<8x32xf32> -> vector<8x32xf32>
    %c0_9 = arith.constant 0 : index
    %c0_10 = arith.constant 0 : index
    %11 = vector.load %arg6[%c0_9, %c0_10] : memref<1x32xf32, #tpu.memory_space<vmem>>, vector<1x32xf32>
    %12 = vector.broadcast %11 : vector<1x32xf32> to vector<8x32xf32>
    %13 = arith.addf %10, %12 : vector<8x32xf32>
    %cst_11 = arith.constant 0.000000e+00 : f32
    %14 = vector.broadcast %cst_11 : f32 to vector<8x32xf32>
    %15 = arith.maximumf %13, %14 : vector<8x32xf32>
    %16 = arith.truncf %15 : vector<8x32xf32> to vector<8x32xbf16>
    %c0_12 = arith.constant 0 : index
    %c0_13 = arith.constant 0 : index
    %c0_14 = arith.constant 0 : index
    %17 = vector.load %arg7[%c0_12, %c0_13, %c0_14] : memref<1x32x128xbf16, #tpu.memory_space<vmem>>, vector<1x32x128xbf16>
    %18 = vector.shape_cast %17 : vector<1x32x128xbf16> to vector<32x128xbf16>
    %cst_15 = arith.constant dense<0.000000e+00> : vector<8x128xf32>
    %19 = tpu.matmul %16, %18, %cst_15 {dimension_numbers = #tpu.dot_dimension_numbers<[1], [0], [0], [1], [0, 0, 1, 1], [], []>} : vector<8x32xbf16>, vector<32x128xbf16>, vector<8x128xf32> -> vector<8x128xf32>
    %c0_16 = arith.constant 0 : index
    %c0_17 = arith.constant 0 : index
    %20 = vector.load %arg8[%c0_16, %c0_17] : memref<8x128xf32, #tpu.memory_space<vmem>>, vector<8x128xf32>
    tpu.vector_store %arg8[%c0_16, %c0_17], %19 {strides = array<i32>} : memref<8x128xf32, #tpu.memory_space<vmem>>, vector<8x128xf32>,
    return
  }
  func.func @transform_0(%arg0: i32, %arg1: i32) -> (i32, i32) {
    %c0_i32 = arith.constant 0 : i32
    %c0_i32_0 = arith.constant 0 : i32
    return %arg0, %c0_i32 : i32, i32
  }
  func.func @transform_1(%arg0: i32, %arg1: i32) -> (i32, i32) {
    %c0_i32 = arith.constant 0 : i32
    %c0_i32_0 = arith.constant 0 : i32
    %c0_i32_1 = arith.constant 0 : i32
    return %c0_i32, %c0_i32_0 : i32, i32
  }
  func.func @transform_2(%arg0: i32, %arg1: i32) -> (i32, i32) {
    %c0_i32 = arith.constant 0 : i32
    %c0_i32_0 = arith.constant 0 : i32
    %c0_i32_1 = arith.constant 0 : i32
    return %c0_i32, %c0_i32_0 : i32, i32
  }
  func.func @transform_3(%arg0: i32, %arg1: i32) -> (i32, i32) {
    %c0_i32 = arith.constant 0 : i32
    %c0_i32_0 = arith.constant 0 : i32
    %c0_i32_1 = arith.constant 0 : i32
    return %c0_i32, %c0_i32_0 : i32, i32
  }
  func.func @transform_4(%arg0: i32, %arg1: i32) -> (i32, i32) {
    %c0_i32 = arith.constant 0 : i32
    %c0_i32_0 = arith.constant 0 : i32
    %c0_i32_1 = arith.constant 0 : i32
    return %c0_i32, %c0_i32_0 : i32, i32
  }
  func.func @transform_5(%arg0: i32, %arg1: i32) -> (i32, i32, i32) {
    %c0_i32 = arith.constant 0 : i32
    %c0_i32_0 = arith.constant 0 : i32
    return %arg0, %c0_i32, %arg1 : i32, i32, i32
  }
  func.func @transform_6(%arg0: i32, %arg1: i32) -> (i32, i32) {
    %c0_i32 = arith.constant 0 : i32
    return %arg0, %arg1 : i32, i32
  }
}

</mosaic_0001>

<bundles_post_ra>
// kernel: tpu_custom_call.1
= control target key start
LH: loop header
LB: loop body
LE: loop exit
PB: predicated region body
PF: predicated region fallthrough
CT: control target
= control target key end

     0   :  { %11 = vsyncpa [#allocation3], 0  ;;  %s2827_s0 = inlined_call_operand.vmem [shape: bf16[16,64], index: 0, kind: input, shape index: {}]   ;;  %s2828_s1 = inlined_call_operand.vmem [shape: bf16[64,1152], index: 1, kind: input, shape index: {}]   ;;  %s2829_s2 = inlined_call_operand.vmem [shape: f32[1,1152], index: 2, kind: input, shape index: {}]   ;;  %s2830_s3 = inlined_call_operand.vmem [shape: bf16[1152,32], index: 3, kind: input, shape index: {}]   ;;  %s2831_s4 = inlined_call_operand.vmem [shape: f32[1,32], index: 4, kind: input, shape index: {}]   ;;  %s2832_s5 = inlined_call_operand.vmem [shape: bf16[2,32,128], index: 5, kind: input, shape index: {}]   ;;  %s2833_s6 = inlined_call_operand.hbm [shape: f32[16,128], index: 6, kind: output, shape index: {}]  }
   0x1   :  { %13 = vsyncpa [#allocation3 + $0x1], 0  ;;  %s2318_s21 = smov 0   ;;  %s2320_s22 = smov 0  }
   0x2   :  { %s2322_s23 = smov 0   ;;  %s2324_s24 = smov 0  }
   0x3   :  { %s2326_s25 = smov 0   ;;  %s2328_s26 = smov 0  }
   0x4 LB: > { %s1740_s27 = sadd.s32 4294967295, %s2277_s26   ;;  %s1741_s28 = sadd.s32 4294967294, %s2277_s26   ;;  %s2277_s26 = sphi %s2328_s26, %s19_s26   ;;  %s2273_s25 = sphi %s2326_s25, %s2840_s25   ;;  %s2269_s24 = sphi %s2324_s24, %s2839_s24   ;;  %s2265_s23 = sphi %s2322_s23, %s2838_s23   ;;  %s2261_s22 = sphi %s2320_s22, %s2837_s22   ;;  %s2257_s21 = sphi %s2318_s21, %s2836_s21  }
   0x5   : > { %s31_s29 = sadd.s32 1, %s2273_s25  ;;  %s178_s30 = sadd.s32 1, %s2265_s23 }
   0x6   : > { %p33_p0 = scmp.ge.s32.totalorder %s31_s29, 2  ;;  %p188_p1 = scmp.ne.s32.totalorder %s2265_s23, %s2261_s22 }
   0x7   : > { %p189_p2 = scmp.eq.s32.totalorder %s1740_s27, 1  ;;  %p194_p3 = scmp.ne.s32.totalorder %s2261_s22, %s2257_s21 }
   0x8   : > { %s2842_s29 = smov (%p33_p0, %s31_s29), 0  ;;  %p195_p5 = scmp.eq.s32.totalorder %s1741_s28, 1 }
   0x9   : > { %p2358_p4 = por %p189_p2, %p188_p1  ;;  %s173_s8 = ssub.s32 %s2273_s25, %s2842_s29 }
   0xa   : > { %p1744_p6 = scmp.ge.s32.totalorder %s2277_s26, 1  ;;  %p176_p7 = scmp.eq.s32.totalorder %s173_s8, 0 }
   0xb   : > { %p2365_p8 = por %p195_p5, %p194_p3  ;;  %p243_p9 = scmp.lt.s32.totalorder %s2277_s26, 3 }
   0xc   : > { %s2371_s10 = scalar_select %p176_p7, %s2265_s23, %s178_s30  }
   0xd   : > { %p244_p10 = pnand %p1744_p6, %p243_p9 }
   0xe   : > { %p280_p11 = scmp.lt.s32.totalorder (!%p244_p10), %s2269_s24, 1  ;;  %s277_s19 = sand.u32 (!%p244_p10), 1, %s2261_s22  }
   0xf   : > { %247 = sbr.rel (%p244_p10) target bundleno = 712 (0x2c8), region = 44  ;;  %s1745_s27 = sshll.u32 (!%p244_p10), %s277_s19, 3 }
  0x10   : > { %s279_s30 = scalar_lea.vmem (!%p244_p10), [#allocation2], %s1745_s27  ;;  %s1640_s16 = scalar_lea.sflag (!%p244_p10), [#allocation3], %s277_s19 }
  0x11   : > { %s1654_s12 = sshll.u32 (!%p244_p10), %s279_s30, 4  ;;  %s2778_s12 = int_to_ptr.vmem [resolvable:$true] %s1654_s12 }
  0x14   : > { %v2075_v0 = vld [vmem:[%s2828_s1 + $0xdc] ss:$36 sps:$4 sm:$0xff]   ;;  %v2279_v2 = vmov 0   ;;  %v2078_v3 = vld [vmem:[%s2828_s1 + $0xe4] ss:$36 sps:$4 sm:$0xff]   ;;  %s2396_s11 = scalar_select %p280_p11, %s2269_s24, 1 }
  0x15   : > { %v2077_v1 = vld [vmem:[%s2828_s1 + $0xd8] ss:$36 sps:$4 sm:$0xff]   ;;  %603 = vmatprep.mubr.bf16.mxu0 %v2279_v2  ;;  %644 = vmatprep.mubr.bf16.mxu1 %v2279_v2  ;;  %v2080_v4 = vld [vmem:[%s2828_s1 + $0xe0] ss:$36 sps:$4 sm:$0xff]   ;;  %v2083_v6 = vld [vmem:[%s2828_s1 + $0x90] ss:$36 sps:$4 sm:$0xff]  }
  0x16   : > { %579 = vmatprep.subr.bf16.mxu0 %v2075_v0  ;;  %v2081_v5 = vld [vmem:[%s2828_s1 + $0x94] ss:$36 sps:$4 sm:$0xff]   ;;  %620 = vmatprep.subr.bf16.mxu1 %v2078_v3  ;;  %v2084_v7 = vld [vmem:[%s2828_s1 + $0x9c] ss:$36 sps:$4 sm:$0xff]   ;;  %v2087_v9 = vld [vmem:[%s2828_s1 + $0x4c] ss:$36 sps:$4 sm:$0xff]  }
  0x17   : > { %580 = vmatpush1.bf16.msra.mxu0 %v2077_v1  ;;  %621 = vmatpush1.bf16.msra.mxu1 %v2080_v4  ;;  %v2086_v8 = vld [vmem:[%s2828_s1 + $0x98] ss:$36 sps:$4 sm:$0xff]   ;;  %v2089_v10 = vld [vmem:[%s2828_s1 + $0x48] ss:$36 sps:$4 sm:$0xff]   ;;  %s1746_s28 = sshll.u32 %s2396_s11, 2  ;;  %vm567_vm0 = vcmask 523264  }
  0x18   : > { %581 = vmatprep.subr.bf16.mxu0 %v2081_v5  ;;  %622 = vmatprep.subr.bf16.mxu1 %v2084_v7  ;;  %v2090_v11 = vld [vmem:[%s2828_s1 + $0x54] ss:$36 sps:$4 sm:$0xff]   ;;  %v2093_v12 = vld [vmem:[%s2828_s1 + $0x4] ss:$36 sps:$4 sm:$0xff]   ;;  %v2096_v14 = vld [vmem:[%s2828_s1 + $0xc] ss:$36 sps:$4 sm:$0xff]   ;;  %s283_s18 = scalar_lea.vmem %s2827_s0, %s1746_s28 }
  0x19   : > { %v2092_v13 = vld [vmem:[%s2828_s1 + $0x50] ss:$36 sps:$4 sm:$0xff]   ;;  %v2095_v15 = vld [vmem:[%s2828_s1] ss:$36 sps:$4 sm:$0xff]   ;;  %v2098_v17 = vld [vmem:[%s2828_s1 + $0x8] ss:$36 sps:$4 sm:$0xff]  }
  0x1a   : > { %v2101_v16 = vld [vmem:[%s2828_s1 + $0xec] ss:$36 sps:$4 sm:$0xff]   ;;  %v2432_v18 = vld [vmem:[%s283_s18] sm:$0xf]  ;;  %v2107_v19 = vld [vmem:[%s2828_s1 + $0xf4] ss:$36 sps:$4 sm:$0xff]  }
  0x1b   : > { %582 = vmatpush1.bf16.msra.mxu0 %v2083_v6  ;;  %623 = vmatpush1.bf16.msra.mxu1 %v2086_v8  ;;  %v2099_v20 = vld [vmem:[%s2828_s1 + $0xe8] ss:$36 sps:$4 sm:$0xff]   ;;  %v2105_v22 = vld [vmem:[%s2828_s1 + $0xf0] ss:$36 sps:$4 sm:$0xff]   ;;  %v2102_v24 = vld [vmem:[%s2828_s1 + $0xa0] ss:$36 sps:$4 sm:$0xff]  }
  0x1c   : > { %583 = vmatprep.subr.bf16.mxu0 %v2087_v9  ;;  %624 = vmatprep.subr.bf16.mxu1 %v2090_v11  ;;  %v2104_v21 = vld [vmem:[%s2828_s1 + $0xa4] ss:$36 sps:$4 sm:$0xff]   ;;  %v2113_v23 = vld [vmem:[%s2828_s1 + $0xac] ss:$36 sps:$4 sm:$0xff]   ;;  %v2110_v25 = vld [vmem:[%s2828_s1 + $0x5c] ss:$36 sps:$4 sm:$0xff]   ;;  %v338_v9 = vlaneseq }
  0x1d   : > { %v2111_v26 = vld [vmem:[%s2828_s1 + $0xa8] ss:$36 sps:$4 sm:$0xff]   ;;  %v2108_v28 = vld [vmem:[%s2828_s1 + $0x58] ss:$36 sps:$4 sm:$0xff]   ;;  %v2117_v30 = vld [vmem:[%s2828_s1 + $0x60] ss:$36 sps:$4 sm:$0xff]  }
  0x1e   : > { %v2119_v27 = vld [vmem:[%s2828_s1 + $0x64] ss:$36 sps:$4 sm:$0xff]   ;;  %v2116_v29 = vld [vmem:[%s2828_s1 + $0x14] ss:$36 sps:$4 sm:$0xff]   ;;  %v2122_v31 = vld [vmem:[%s2828_s1 + $0x1c] ss:$36 sps:$4 sm:$0xff]  }
  0x1f   : > { %584 = vmatpush1.bf16.msra.mxu0 %v2089_v10  ;;  %625 = vmatpush1.bf16.msra.mxu1 %v2092_v13  ;;  %v2114_v32 = vld [vmem:[%s2828_s1 + $0x10] ss:$36 sps:$4 sm:$0xff]   ;;  %v2120_v33 = vld [vmem:[%s2828_s1 + $0x18] ss:$36 sps:$4 sm:$0xff]   ;;  %v2280_v36 = vmov 0.0   ;;  %vm2281_vm1 = vmmov 0  }
  0x20   : > { %585 = vmatprep.subr.bf16.mxu0 %v2093_v12  ;;  %626 = vmatprep.subr.bf16.mxu1 %v2096_v14  ;;  %v2127_v34 = vld [vmem:[%s2830_s3 + $0x78] sm:$0xff]   ;;  %v2131_v38 = vld [vmem:[%s2830_s3 + $0x70] sm:$0xff]   ;;  %v2135_v41 = vld [vmem:[%s2830_s3 + $0x68] sm:$0xff]   ;;  %s1871_s20 = sshll.u32 %s2396_s11, 4  ;;  %v2617_v10 = vshrl.u32 %v338_v9, 7  ;;  %vm1594_vm2 = vcmask 261120  }
  0x21   : > { %v2123_v35 = vld [vmem:[%s2828_s1 + $0xf8] ss:$36 sps:$4 sm:$0xff]   ;;  %v2124_v39 = vld [vmem:[%s2828_s1 + $0xb0] ss:$36 sps:$4 sm:$0xff]   ;;  %v2125_v42 = vld [vmem:[%s2828_s1 + $0x68] ss:$36 sps:$4 sm:$0xff]   ;;  %s2585_s8 = scalar_lea.vmem %s2832_s5, %s1871_s20 }
  0x22   : > { %v2128_v37 = vld [vmem:[%s2830_s3 + $0x38] sm:$0xff]   ;;  %v2132_v40 = vld [vmem:[%s2830_s3 + $0x30] sm:$0xff]   ;;  %v2136_v43 = vld [vmem:[%s2830_s3 + $0x28] sm:$0xff]   ;;  %v340_v11 = vsub.s32 0, %v2617_v10  ;;  %v344_v13 = vsub.s32 1, %v2617_v10  ;;  %v348_v14 = vsub.s32 2, %v2617_v10 }
  0x23   : > { %586 = vmatpush1.bf16.msra.mxu0 %v2095_v15  ;;  %627 = vmatpush1.bf16.msra.mxu1 %v2098_v17  ;;  %v2139_v44 = vld [vmem:[%s2830_s3 + $0x60] sm:$0xff]   ;;  %v2129_v46 = vld [vmem:[%s2830_s3 + $0xf8] sm:$0xff]   ;;  %v2133_v50 = vld [vmem:[%s2830_s3 + $0xf0] sm:$0xff]   ;;  %s1868_s28 = sshll.u32 %s2269_s24, 7  ;;  %s2201_s11 = scalar_lea.vmem %s2778_s12, 128 }
  0x24   : > { %661 = vmatprep.subr.bf16.mxu0 %v2101_v16  ;;  %702 = vmatprep.subr.bf16.mxu1 %v2107_v19  ;;  %v2126_v45 = vld [vmem:[%s2828_s1 + $0x20] ss:$36 sps:$4 sm:$0xff]   ;;  %v2130_v47 = vld [vmem:[%s2830_s3 + $0xb8] sm:$0xff]   ;;  %v2147_v52 = vld [vmem:[%s2830_s3 + $0x50] sm:$0xff]   ;;  %v352_v16 = vsub.s32 3, %v2617_v10  ;;  %s2783_s15 = scalar_lea.hbm %s2833_s6, %s1868_s28  ;;  %p2202_p12 = scmp.ne.s32.totalorder %s2778_s12, %s2201_s11 }
  0x25   : > { %v2140_v48 = vld [vmem:[%s2830_s3 + $0x20] sm:$0xff]   ;;  %v2143_v49 = vld [vmem:[%s2830_s3 + $0x58] sm:$0xff]   ;;  %v2134_v53 = vld [vmem:[%s2830_s3 + $0xb0] sm:$0xff]   ;;  %s2282_s24 = smov [#allocation2]  }
  0x26   : > { %1786 = vmatmul.mubr.msk.bf16.vlgmr.msra.gmra.mxu0 %vm567_vm0, %v2432_v18  ;;  %1787 = vmatmul.mubr.msk.bf16.vlgmr.msra.gmra.mxu1 %vm567_vm0, %v2432_v18  ;;  %v2144_v51 = vld [vmem:[%s2830_s3 + $0x18] sm:$0xff]   ;;  %v2137_v54 = vld [vmem:[%s2830_s3 + $0xe8] sm:$0xff]   ;;  %v2148_v55 = vld [vmem:[%s2830_s3 + $0x10] sm:$0xff]   ;;  %p2203_p13 = pnand %p2202_p12, %p2358_p4  ;;  %s2205_s17 = sshll.u32 %s2282_s24, 4  ;;  %s2206_s17 = int_to_ptr.vmem [resolvable:$false] %s2205_s17 }
  0x27   : > { %662 = vmatpush1.bf16.msra.mxu0 %v2099_v20  ;;  %685 = vmatprep.mubr.bf16.mxu0 %v2279_v2  ;;  %v2138_v56 = vld [vmem:[%s2830_s3 + $0xa8] sm:$0xff]   ;;  %v2141_v57 = vld [vmem:[%s2830_s3 + $0xe0] sm:$0xff]   ;;  %v2145_v59 = vld [vmem:[%s2830_s3 + $0xd8] sm:$0xff]   ;;  %s2207_s20 = scalar_lea.vmem %s2206_s17, 256  ;;  %p2208_p1 = scmp.lt.s32.totalorder %s2778_s12, %s2206_s17 }
  0x28   : > { %663 = vmatprep.subr.bf16.mxu0 %v2104_v21  ;;  %703 = vmatpush1.bf16.msra.mxu1 %v2105_v22  ;;  %v2142_v58 = vld [vmem:[%s2830_s3 + $0xa0] sm:$0xff]   ;;  %v2146_v60 = vld [vmem:[%s2830_s3 + $0x98] sm:$0xff]   ;;  %v2149_v61 = vld [vmem:[%s2830_s3 + $0xd0] sm:$0xff]   ;;  %p2204_p0 = pneg %p2203_p13  ;;  %p2209_p2 = scmp.lt.s32.totalorder %s2207_s20, %s2201_s11 }
  0x29   : > { %726 = vmatprep.mubr.bf16.mxu1 %v2279_v2  ;;  %704 = vmatprep.subr.bf16.mxu1 %v2113_v23  ;;  %v2150_v62 = vld [vmem:[%s2830_s3 + $0x90] sm:$0xff]   ;;  %v2151_v63 = vld [vmem:[%s2830_s3 + $0x48] sm:$0xff]   ;;  %v2155_v3 = vld [vmem:[%s2830_s3 + $0x40] sm:$0xff]  }
  0x2a   : > { %v2152_v0 = vld [vmem:[%s2830_s3 + $0x8] sm:$0xff]   ;;  %v2156_v4 = vld [vmem:[%s2830_s3] sm:$0xff]   ;;  %v2159_v7 = vld [vmem:[%s2830_s3 + $0x178] sm:$0xff]   ;;  %p2210_p3 = por %p2209_p2, %p2208_p1 }
  0x2b   : > { %664 = vmatpush1.bf16.msra.mxu0 %v2102_v24  ;;  %v2153_v1 = vld [vmem:[%s2830_s3 + $0xc8] sm:$0xff]   ;;  %v2157_v5 = vld [vmem:[%s2830_s3 + $0xc0] sm:$0xff]   ;;  %v2161_v8 = vld [vmem:[%s2830_s3 + $0x1f8] sm:$0xff]  }
  0x2c   : > { %665 = vmatprep.subr.bf16.mxu0 %v2110_v25  ;;  %705 = vmatpush1.bf16.msra.mxu1 %v2111_v26  ;;  %v2154_v2 = vld [vmem:[%s2830_s3 + $0x88] sm:$0xff]   ;;  %v2158_v6 = vld [vmem:[%s2830_s3 + $0x80] sm:$0xff]   ;;  %p2211_p5 = pnand %p2210_p3, %p2204_p0 }
  0x2d   : > { %706 = vmatprep.subr.bf16.mxu1 %v2119_v27  ;;  %v2623_v12 = vld [vmem:[%s2829_s2] sm:$0xff] }
  0x2e   : > { %v341_v15 = vrot.slane %v2623_v12, %v340_v11  ;;  %v345_v17 = vrot.slane %v2623_v12, %v344_v13  ;;  %v353_v21 = vrot.slane %v2623_v12, %v352_v16  ;;  %v356_v11 = vsub.s32 4, %v2617_v10  ;;  %v2179_v13 = vld [vmem:[%s2830_s3 + $0x150] sm:$0xff]   ;;  %v2178_v16 = vld [vmem:[%s2830_s3 + $0x198] sm:$0xff]  }
  0x2f   : > { %666 = vmatpush1.bf16.msra.mxu0 %v2108_v28 }
  0x30   : > { %667 = vmatprep.subr.bf16.mxu0 %v2116_v29  ;;  %707 = vmatpush1.bf16.msra.mxu1 %v2117_v30 }
  0x31   : > { %708 = vmatprep.subr.bf16.mxu1 %v2122_v31 }
  0x33   : > { %668 = vmatpush1.bf16.msra.mxu0 %v2114_v32 }
  0x34   : > { %1977 = vmatprep.subr.bf16.mxu0 %v2280_v36  ;;  %709 = vmatpush1.bf16.msra.mxu1 %v2120_v33 }
  0x35   : > { %1877 = vmatprep.subr.bf16.mxu1 %v2127_v34 }
  0x36   : > { %1788 = vmatmul.mubr.msk.bf16.vlgmr.msra.gmra.mxu0 %vm567_vm0, %v2432_v18 }
  0x37   : > { %1978 = vmatpush3.bf16.msra.mxu0 %v2123_v35  ;;  %1985 = vmatprep.mubr.msk.bf16.mxu0 %vm2281_vm1, %v2280_v36 }
  0x38   : > { %1789 = vmatmul.mubr.msk.bf16.vlgmr.msra.gmra.mxu1 %vm567_vm0, %v2432_v18  ;;  %1979 = vmatprep.subr.bf16.mxu0 %v2280_v36 }
  0x39   : > { %1878 = vmatpush3.bf16.msra.mxu1 %v2128_v37  ;;  %v2160_v37 = vld [vmem:[%s2830_s3 + $0x138] sm:$0xff]  }
  0x3a   : > { %1879 = vmatprep.subr.bf16.mxu1 %v2131_v38 }
  0x3b   : > { %1980 = vmatpush3.bf16.msra.mxu0 %v2124_v39 }
  0x3c   : > { %1981 = vmatprep.subr.bf16.mxu0 %v2280_v36 }
  0x3d   : > { %1880 = vmatpush3.bf16.msra.mxu1 %v2132_v40  ;;  %v2163_v40 = vld [vmem:[%s2830_s3 + $0x170] sm:$0xff]  }
  0x3e   : > { %1881 = vmatprep.subr.bf16.mxu1 %v2135_v41 }
  0x3f   : > { %1982 = vmatpush3.bf16.msra.mxu0 %v2125_v42 }
  0x40   : > { %1983 = vmatprep.subr.bf16.mxu0 %v2280_v36 }
  0x41   : > { %1882 = vmatpush3.bf16.msra.mxu1 %v2136_v43  ;;  %v2162_v43 = vld [vmem:[%s2830_s3 + $0x1b8] sm:$0xff]  }
  0x42   : > { %1883 = vmatprep.subr.bf16.mxu1 %v2139_v44  ;;  %v2165_v44 = vld [vmem:[%s2830_s3 + $0x1f0] sm:$0xff]  }
  0x43   : > { %1984 = vmatpush3.bf16.msra.mxu0 %v2126_v45  ;;  %v2164_v45 = vld [vmem:[%s2830_s3 + $0x130] sm:$0xff]  }
  0x44   : > { %1899 = vmatprep.subr.bf16.mxu0 %v2129_v46  ;;  %v360_v46 = vsub.s32 5, %v2617_v10 }
  0x45   : > { %1884 = vmatpush3.bf16.msra.mxu1 %v2140_v48  ;;  %v2166_v48 = vld [vmem:[%s2830_s3 + $0x1b0] sm:$0xff]  }
  0x46   : > { %1986 = vmatmul.mubr.msk.bf16.vlgmr.msra.gmra.mxu0 %vm567_vm0, %v2432_v18  ;;  %1885 = vmatprep.subr.bf16.mxu1 %v2143_v49  ;;  %v349_v18 = vrot.slane %v2623_v12, %v348_v14  ;;  %v368_v49 = vsub.s32 7, %v2617_v10  ;;  %v364_v14 = vsub.s32 6, %v2617_v10  ;;  %v357_v10 = vrot.slane %v2623_v12, %v356_v11 }
  0x47   : > { %1900 = vmatpush3.bf16.msra.mxu0 %v2130_v47  ;;  %v2167_v47 = vld [vmem:[%s2830_s3 + $0x168] sm:$0xff]  }
  0x48   : > { %1901 = vmatprep.subr.bf16.mxu0 %v2133_v50  ;;  %v2169_v50 = vld [vmem:[%s2830_s3 + $0x1e8] sm:$0xff]  }
  0x49   : > { %1886 = vmatpush3.bf16.msra.mxu1 %v2144_v51  ;;  %v2168_v51 = vld [vmem:[%s2830_s3 + $0x128] sm:$0xff]  }
  0x4a   : > { %1887 = vmatprep.subr.bf16.mxu1 %v2147_v52  ;;  %v361_v52 = vrot.slane %v2623_v12, %v360_v46  ;;  %v2196_v46 = vld [vmem:[%s2830_s3 + $0x210] sm:$0xff]  }
  0x4b   : > { %1902 = vmatpush3.bf16.msra.mxu0 %v2134_v53  ;;  %v2171_v53 = vld [vmem:[%s2830_s3 + $0x160] sm:$0xff]  }
  0x4c   : > { %1903 = vmatprep.subr.bf16.mxu0 %v2137_v54 }
  0x4d   : > { %1888 = vmatpush3.bf16.msra.mxu1 %v2148_v55  ;;  %v2170_v55 = vld [vmem:[%s2830_s3 + $0x1a8] sm:$0xff]  }
  0x4e   : > { %1889 = vmatprep.subr.bf16.mxu1 %v2151_v63 }
  0x4f   : > { %1904 = vmatpush3.bf16.msra.mxu0 %v2138_v56  ;;  %v369_v56 = vrot.slane %v2623_v12, %v368_v49 }
  0x50   : > { %1905 = vmatprep.subr.bf16.mxu0 %v2141_v57  ;;  %v2173_v57 = vld [vmem:[%s2830_s3 + $0x1e0] sm:$0xff]  }
  0x51   : > { %1890 = vmatpush3.bf16.msra.mxu1 %v2152_v0 }
  0x52   : > { %1891 = vmatprep.subr.bf16.mxu1 %v2155_v3 }
  0x53   : > { %1906 = vmatpush3.bf16.msra.mxu0 %v2142_v58 }
  0x54   : > { %1907 = vmatprep.subr.bf16.mxu0 %v2145_v59 }
  0x55   : > { %1892 = vmatpush3.bf16.msra.mxu1 %v2156_v4  ;;  %v2177_v4 = vld [vmem:[%s2830_s3 + $0x1d8] sm:$0xff]  }
  0x56   : > { %1921 = vmatprep.subr.bf16.mxu1 %v2159_v7  ;;  %v2176_v7 = vld [vmem:[%s2830_s3 + $0x118] sm:$0xff]  }
  0x57   : > { %1908 = vmatpush3.bf16.msra.mxu0 %v2146_v60  ;;  %v2172_v60 = vld [vmem:[%s2830_s3 + $0x120] sm:$0xff]  }
  0x58   : > { %1909 = vmatprep.subr.bf16.mxu0 %v2149_v61 }
  0x5b   : > { %1910 = vmatpush3.bf16.msra.mxu0 %v2150_v62  ;;  %v2175_v62 = vld [vmem:[%s2830_s3 + $0x158] sm:$0xff]  }
  0x5c   : > { %1911 = vmatprep.subr.bf16.mxu0 %v2153_v1  ;;  %v2174_v1 = vld [vmem:[%s2830_s3 + $0x1a0] sm:$0xff]  }
  0x5f   : > { %1912 = vmatpush3.bf16.msra.mxu0 %v2154_v2 }
  0x60   : > { %1913 = vmatprep.subr.bf16.mxu0 %v2157_v5 }
  0x63   : > { %1914 = vmatpush3.bf16.msra.mxu0 %v2158_v6 }
  0x64   : > { %1943 = vmatprep.subr.bf16.mxu0 %v2161_v8 }
  0xe6   : > { %v605_v19 = vpop.f32.mrf.mxu0  ;;  %v646_v23 = vpop.f32.mrf.mxu1 }
  0xe7   : > { %v606_v20 = vadd.f32 %v605_v19, %v341_v15  ;;  %v647_v25 = vadd.f32 %v646_v23, %v349_v18  ;;  %v2181_v18 = vld [vmem:[%s2830_s3 + $0x1d0] sm:$0xff]   ;;  %v2185_v23 = vld [vmem:[%s2830_s3 + $0x1c8] sm:$0xff]  }
  0xe8   : > { %v607_v22 = vpop.f32.mrf.mxu0  ;;  %v648_v28 = vpop.f32.mrf.mxu1  ;;  %v2180_v19 = vld [vmem:[%s2830_s3 + $0x110] sm:$0xff]  }
  0xe9   : > { %v608_v24 = vadd.f32 %v607_v22, %v345_v17  ;;  %v775_v26 = vmax.f32 %v606_v20, 0.0  ;;  %v777_v30 = vmax.f32 %v647_v25, 0.0  ;;  %v649_v31 = vadd.f32 %v648_v28, %v353_v21  ;;  %v2183_v21 = vld [vmem:[%s2830_s3 + $0x148] sm:$0xff]   ;;  %v2182_v22 = vld [vmem:[%s2830_s3 + $0x190] sm:$0xff]  }
  0xea   : > { %v609_v27 = vpop.f32.mrf.mxu0  ;;  %v650_v33 = vpop.f32.mrf.mxu1  ;;  %v365_v20 = vrot.slane %v2623_v12, %v364_v14  ;;  %v2186_v28 = vld [vmem:[%s2830_s3 + $0x188] sm:$0xff]  }
  0xeb   : > { %v776_v29 = vmax.f32 %v608_v24, 0.0  ;;  %v778_v35 = vmax.f32 %v649_v31, 0.0  ;;  %v784_v38 = vpack.c.bf16 %v775_v26, %v775_v26  ;;  %v786_v39 = vpack.c.bf16 %v777_v30, %v777_v30  ;;  %v2184_v24 = vld [vmem:[%s2830_s3 + $0x108] sm:$0xff]   ;;  %v2187_v26 = vld [vmem:[%s2830_s3 + $0x140] sm:$0xff]  }
  0xec   : > { %v610_v32 = vpop.f32.mrf.mxu0  ;;  %v651_v41 = vpop.f32.mrf.mxu1  ;;  %v2188_v31 = vld [vmem:[%s2830_s3 + $0x100] sm:$0xff]  }
  0xed   : > { %v785_v34 = vpack.c.bf16 %v776_v29, %v776_v29  ;;  %v787_v42 = vpack.c.bf16 %v778_v35, %v778_v35  ;;  %v2189_v29 = vld [vmem:[%s2830_s3 + $0x1c0] sm:$0xff]   ;;  %v2192_v41 = vld [vmem:[%s2830_s3 + $0x230] sm:$0xff]  }
  0xee   : > { %v2190_v35 = vld [vmem:[%s2830_s3 + $0x180] sm:$0xff]  }
  0xef   : > { %1408 = vmatprep.mubr.bf16.mxu1 %v785_v34  ;;  %1448 = vmatprep.mubr.bf16.mxu0 %v787_v42  ;;  %v2193_v42 = vld [vmem:[%s2830_s3 + $0x228] sm:$0xff]  }
  0xf0   : > { %1409 = vmatmul.mubr.bf16.vlgmr.msra.gmra.mxu1 %v784_v38  ;;  %1449 = vmatmul.mubr.bf16.vlgmr.msra.gmra.mxu0 %v786_v39  ;;  %v2191_v38 = vld [vmem:[%s2830_s3 + $0x238] sm:$0xff]  }
  0xf1   : > { %1922 = vmatpush3.bf16.msra.mxu1 %v2160_v37  ;;  %1944 = vmatpush3.bf16.msra.mxu0 %v2162_v43  ;;  %v2194_v43 = vld [vmem:[%s2830_s3 + $0x220] sm:$0xff]  }
  0xf2   : > { %1923 = vmatprep.subr.bf16.mxu1 %v2163_v40  ;;  %1945 = vmatprep.subr.bf16.mxu0 %v2165_v44  ;;  %v2195_v44 = vld [vmem:[%s2830_s3 + $0x218] sm:$0xff]  }
  0xf5   : > { %1924 = vmatpush3.bf16.msra.mxu1 %v2164_v45  ;;  %1946 = vmatpush3.bf16.msra.mxu0 %v2166_v48  ;;  %v1749_v45 = vld [vmem:[%s2829_s2 + $0x8] ss:$0 sm:$0xff] }
  0xf6   : > { %1925 = vmatprep.subr.bf16.mxu1 %v2167_v47  ;;  %v687_v54 = vpop.f32.mrf.mxu0  ;;  %1947 = vmatprep.subr.bf16.mxu0 %v2169_v50  ;;  %v2197_v48 = vld [vmem:[%s2830_s3 + $0x208] sm:$0xff]   ;;  %v2198_v50 = vld [vmem:[%s2830_s3 + $0x200] sm:$0xff]  }
  0xf7   : > { %v688_v12 = vadd.f32 %v687_v54, %v357_v10 }
  0xf8   : > { %v689_v58 = vpop.f32.mrf.mxu0  ;;  %v728_v59 = vpop.f32.mrf.mxu1 }
  0xf9   : > { %1926 = vmatpush3.bf16.msra.mxu1 %v2168_v51  ;;  %v690_v61 = vadd.f32 %v689_v58, %v361_v52  ;;  %1948 = vmatpush3.bf16.msra.mxu0 %v2170_v55  ;;  %v729_v25 = vadd.f32 %v728_v59, %v365_v20  ;;  %v779_v32 = vmax.f32 %v688_v12, 0.0  ;;  %v2199_v52 = vld [vmem:[%s2585_s8 + $0x8] sm:$0xff]  }
  0xfa   : > { %1927 = vmatprep.subr.bf16.mxu1 %v2171_v53  ;;  %v691_v63 = vpop.f32.mrf.mxu0  ;;  %v730_v0 = vpop.f32.mrf.mxu1  ;;  %1949 = vmatprep.subr.bf16.mxu0 %v2173_v57  ;;  %v2200_v53 = vld [vmem:[%s2585_s8] sm:$0xff]  }
  0xfb   : > { %v780_v2 = vmax.f32 %v690_v61, 0.0  ;;  %v731_v3 = vadd.f32 %v730_v0, %v369_v56  ;;  %v781_v33 = vmax.f32 %v729_v25, 0.0  ;;  %v788_v39 = vpack.c.bf16 %v779_v32, %v779_v32 }
  0xfc   : > { %v692_v5 = vpop.f32.mrf.mxu0  ;;  %v732_v6 = vpop.f32.mrf.mxu1 }
  0xfd   : > { %1928 = vmatpush3.bf16.msra.mxu1 %v2172_v60  ;;  %v789_v8 = vpack.c.bf16 %v780_v2, %v780_v2  ;;  %v782_v9 = vmax.f32 %v731_v3, 0.0  ;;  %1950 = vmatpush3.bf16.msra.mxu0 %v2174_v1  ;;  %v790_v40 = vpack.c.bf16 %v781_v33, %v781_v33 }
  0xfe   : > { %1929 = vmatprep.subr.bf16.mxu1 %v2175_v62  ;;  %v733_v15 = vpop.f32.mrf.mxu1  ;;  %1951 = vmatprep.subr.bf16.mxu0 %v2177_v4 }
  0xff   : > { %v791_v17 = vpack.c.bf16 %v782_v9, %v782_v9  ;;  %1488 = vmatprep.mubr.bf16.mxu1 %v789_v8 }
 0x101   : > { %1930 = vmatpush3.bf16.msra.mxu1 %v2176_v7  ;;  %1528 = vmatprep.mubr.bf16.mxu0 %v791_v17 }
 0x102   : > { %1931 = vmatprep.subr.bf16.mxu1 %v2179_v13  ;;  %1952 = vmatpush3.bf16.msra.mxu0 %v2178_v16 }
 0x103   : > { %1953 = vmatprep.subr.bf16.mxu0 %v2181_v18 }
 0x105   : > { %1932 = vmatpush3.bf16.msra.mxu1 %v2180_v19 }
 0x106   : > { %1933 = vmatprep.subr.bf16.mxu1 %v2183_v21  ;;  %v769_v27 = vpop.f32.mrf.mxu0  ;;  %1954 = vmatpush3.bf16.msra.mxu0 %v2182_v22 }
 0x107   : > { %1955 = vmatprep.subr.bf16.mxu0 %v2185_v23  ;;  %v770_v47 = vadd.f32 %v1749_v45, %v769_v27 }
 0x108   : > { %v1987_v30 = vpop.f32.mrf.mxu0 }
 0x109   : > { %1934 = vmatpush3.bf16.msra.mxu1 %v2184_v24  ;;  %v783_v49 = vmax.f32 %v770_v47, 0.0 }
 0x10a   : > { %1935 = vmatprep.subr.bf16.mxu1 %v2187_v26  ;;  %v772_v34 = vpop.f32.mrf.mxu0  ;;  %1956 = vmatpush3.bf16.msra.mxu0 %v2186_v28 }
 0x10b   : > { %1957 = vmatprep.subr.bf16.mxu0 %v2189_v29  ;;  %v792_v51 = vpack.c.bf16 %v783_v49, %v783_v49 }
 0x10c   : > { %v1988_v37 = vpop.f32.mrf.mxu0 }
 0x10d   : > { %1936 = vmatpush3.bf16.msra.mxu1 %v2188_v31 }
 0x10e   : > { %1989 = vmatprep.subr.bf16.mxu1 %v2280_v36  ;;  %1958 = vmatpush3.bf16.msra.mxu0 %v2190_v35 }
 0x10f   : > { %2009 = vmatprep.subr.bf16.mxu0 %v2280_v36 }
 0x110   : > { %1489 = vmatmul.mubr.bf16.vlgmr.msra.gmra.mxu1 %v788_v39 }
 0x111   : > { %1990 = vmatpush3.bf16.msra.mxu1 %v2191_v38  ;;  %2005 = vmatprep.mubr.msk.bf16.mxu1 %vm2281_vm1, %v2280_v36 }
 0x112   : > { %1529 = vmatmul.mubr.bf16.vlgmr.msra.gmra.mxu0 %v790_v40  ;;  %1991 = vmatprep.subr.bf16.mxu1 %v2280_v36 }
 0x113   : > { %2013 = vmatprep.mubr.msk.bf16.mxu0 %vm2281_vm1, %v2280_v36  ;;  %2010 = vmatpush3.bf16.msra.mxu0 %v2199_v52 }
 0x114   : > { %2011 = vmatprep.subr.bf16.mxu0 %v2280_v36 }
 0x115   : > { %1992 = vmatpush3.bf16.msra.mxu1 %v2192_v41 }
 0x116   : > { %1993 = vmatprep.subr.bf16.mxu1 %v2280_v36 }
 0x117   : > { %2012 = vmatpush3.bf16.msra.mxu0 %v2200_v53 }
 0x119   : > { %1994 = vmatpush3.bf16.msra.mxu1 %v2193_v42 }
 0x11a   : > { %1995 = vmatprep.subr.bf16.mxu1 %v2280_v36 }
 0x11d   : > { %1996 = vmatpush3.bf16.msra.mxu1 %v2194_v43 }
 0x11e   : > { %1997 = vmatprep.subr.bf16.mxu1 %v2280_v36 }
 0x121   : > { %1998 = vmatpush3.bf16.msra.mxu1 %v2195_v44 }
 0x122   : > { %1999 = vmatprep.subr.bf16.mxu1 %v2280_v36 }
 0x125   : > { %2000 = vmatpush3.bf16.msra.mxu1 %v2196_v46 }
 0x126   : > { %2001 = vmatprep.subr.bf16.mxu1 %v2280_v36 }
 0x129   : > { %2002 = vmatpush3.bf16.msra.mxu1 %v2197_v48 }
 0x12a   : > { %2003 = vmatprep.subr.bf16.mxu1 %v2280_v36  ;;  %v1791_v36 = vld [vmem:[%s2831_s4] ss:$0 sm:$0xff] }
 0x12d   : > { %2004 = vmatpush3.bf16.msra.mxu1 %v2198_v50 }
 0x130   : > { %2006 = vmatmul.mubr.bf16.vlgmr.msra.gmra.mxu1 %v792_v51 }
 0x1b0   : > { %v1893_v54 = vpop.f32.mrf.mxu1  ;;  %v1915_v56 = vpop.f32.mrf.mxu0 }
 0x1b2   : > { %v1894_v55 = vpop.f32.mrf.mxu1  ;;  %v1916_v58 = vpop.f32.mrf.mxu0 }
 0x1b3   : > { %v1895_v6 = vadd.f32 %v1894_v55, %v1893_v54  ;;  %v1917_v8 = vadd.f32 %v1916_v58, %v1915_v56 }
 0x1b4   : > { %v1896_v57 = vpop.f32.mrf.mxu1  ;;  %v1918_v60 = vpop.f32.mrf.mxu0 }
 0x1b5   : > { %v1411_v7 = vadd.f32 %v1895_v6, %v1791_v36 }
 0x1b6   : > { %v1897_v59 = vpop.f32.mrf.mxu1  ;;  %v1919_v61 = vpop.f32.mrf.mxu0 }
 0x1b7   : > { %v1451_v11 = vadd.f32 %v1917_v8, %v1411_v7 }
 0x1d0   : > { %v1937_v62 = vpop.f32.mrf.mxu1 }
 0x1d2   : > { %v1938_v63 = vpop.f32.mrf.mxu1  ;;  %v1959_v0 = vpop.f32.mrf.mxu0 }
 0x1d3   : > { %v1939_v9 = vadd.f32 %v1938_v63, %v1937_v62 }
 0x1d4   : > { %v1940_v1 = vpop.f32.mrf.mxu1  ;;  %v1960_v2 = vpop.f32.mrf.mxu0 }
 0x1d5   : > { %v1491_v13 = vadd.f32 %v1939_v9, %v1451_v11  ;;  %v1961_v14 = vadd.f32 %v1960_v2, %v1959_v0 }
 0x1d6   : > { %v1941_v3 = vpop.f32.mrf.mxu1  ;;  %v1962_v4 = vpop.f32.mrf.mxu0 }
 0x1d7   : > { %v1531_v15 = vadd.f32 %v1961_v14, %v1491_v13 }
 0x1d8   : > { %v1963_v5 = vpop.f32.mrf.mxu0 }
 0x1f0   : > { %v1570_v16 = vpop.f32.mrf.mxu1 }
 0x1f1   : > { %v1571_v17 = vadd.f32 %v1570_v16, %v1531_v15 }
 0x1f2   : > { %v2007_v18 = vpop.f32.mrf.mxu1 }
 0x1f3   : > { %v1576_v19 = vmax.f32 %v1571_v17, 0.0 }
 0x1f4   : > { %v1573_v10 = vpop.f32.mrf.mxu1 }
 0x1f5   : > { %v1577_v20 = vpack.c.bf16 %v1576_v19, %v1576_v19 }
 0x1f6   : > { %v2008_v21 = vpop.f32.mrf.mxu1 }
 0x1f7   : > { %2014 = vmatmul.mubr.msk.bf16.vlgmr.msra.gmra.mxu0 %vm1594_vm2, %v1577_v20 }
 0x2b7   : > { %v1632_v22 = vpop.f32.mrf.mxu0 }
 0x2b8   : > { %1638 = vst [vmem:[%s279_s30] sm:$0xff] %v1632_v22 }
 0x2b9   : > { %v2015_v23 = vpop.f32.mrf.mxu0 }
 0x2ba   : > { %2214 = shalt.err (!%p2211_p5)
}
 0x2bb   : > { %s2215_s18 = scalar_lea.hbm %s2783_s15, 128  ;;  %s2219_s27 = scalar_lea.hbm %s2833_s6, 256 }
 0x2bc   : > { %p2216_p6 = scmp.ne.s32.totalorder %s2783_s15, %s2215_s18  ;;  %p2220_p10 = scmp.lt.s32.totalorder %s2783_s15, %s2833_s6 }
 0x2bd   : > { %p2221_p11 = scmp.lt.s32.totalorder %s2219_s27, %s2215_s18 }
 0x2be   : > { %p2217_p7 = pnand %p2216_p6, %p2358_p4 }
 0x2bf   : > { %p2222_p12 = por %p2221_p11, %p2220_p10 }
 0x2c0   : > { %p2218_p9 = pneg %p2217_p7 }
 0x2c2   : > { %p2223_p13 = pnand %p2222_p12, %p2218_p9 }
 0x2c4   : > { %2226 = shalt.err (!%p2223_p13)
}
 0x2c5   : > { %2017 = dma.vmem_to_hbm [thread:$0]  (%p2358_p4), %s2778_s12, 128, %s2783_s15, %s1640_s16   ;;  %v1635_v24 = vpop.f32.mrf.mxu0 }
 0x2c7   : > { %v2016_v12 = vpop.f32.mrf.mxu0 }
 0x2c8 PF: > { %p2023_p0 = scmp.ge.s32.totalorder %s2277_s26, 2  ;;  %s1666_s13 = sand.u32 1, %s2257_s21  }
 0x2c9   : > { %s1667_s14 = scalar_lea.sflag [#allocation3], %s1666_s13 }
 0x2ca   : > { %p2020_p1 = pnand %p2023_p0, %p2365_p8 }
 0x2cc   : > { %p2021_p2 = pneg %p2020_p1 }
 0x2ce   : > { %2252 = dma.done.wait (%p2021_p2), %s1667_s14, 128  }
 0x2cf   : > { %2254 = vsyncadd (%p2021_p2), %s1667_s14, 4294967168  ;;  %s19_s26 = sadd.s32 1, %s2277_s26   ;;  %s2836_s21 = smov %s2261_s22 }
 0x2d0   : > { %p16_p3 = scmp.ge.s32.totalorder %s19_s26, 4   ;;  %s2837_s22 = smov %s2265_s23 }
 0x2d1   : > { %s2838_s23 = smov %s2371_s10  ;;  %s2839_s24 = smov %s2273_s25 }
 0x2d2   : > { %s2840_s25 = smov %s2842_s29  ;;  %18 = sbr.rel (!%p16_p3) target bundleno = 4 (0x4), region = 82 }
 0x2d7   :  { %1672 = vsyncpa [#allocation3], 1 }
 0x2d8   :  { %1674 = vsyncpa [#allocation3 + $0x1], 1 }

// kernel: tpu_custom_call.1
= control target key start
LH: loop header
LB: loop body
LE: loop exit
PB: predicated region body
PF: predicated region fallthrough
CT: control target
= control target key end

     0   :  { %11 = vsyncpa [#allocation3], 0  ;;  %s2827_s0 = inlined_call_operand.vmem [shape: bf16[16,64], index: 0, kind: input, shape index: {}]   ;;  %s2828_s1 = inlined_call_operand.vmem [shape: bf16[64,1152], index: 1, kind: input, shape index: {}]   ;;  %s2829_s2 = inlined_call_operand.vmem [shape: f32[1,1152], index: 2, kind: input, shape index: {}]   ;;  %s2830_s3 = inlined_call_operand.vmem [shape: bf16[1152,32], index: 3, kind: input, shape index: {}]   ;;  %s2831_s4 = inlined_call_operand.vmem [shape: f32[1,32], index: 4, kind: input, shape index: {}]   ;;  %s2832_s5 = inlined_call_operand.vmem [shape: bf16[2,32,128], index: 5, kind: input, shape index: {}]   ;;  %s2833_s6 = inlined_call_operand.hbm [shape: f32[16,128], index: 6, kind: output, shape index: {}]  }
   0x1   :  { %13 = vsyncpa [#allocation3 + $0x1], 0  ;;  %s2318_s21 = smov 0   ;;  %s2320_s22 = smov 0  }
   0x2   :  { %s2322_s23 = smov 0   ;;  %s2324_s24 = smov 0  }
   0x3   :  { %s2326_s25 = smov 0   ;;  %s2328_s26 = smov 0  }
   0x4 LB: > { %s1740_s27 = sadd.s32 4294967295, %s2277_s26   ;;  %s1741_s28 = sadd.s32 4294967294, %s2277_s26   ;;  %s2277_s26 = sphi %s2328_s26, %s19_s26   ;;  %s2273_s25 = sphi %s2326_s25, %s2840_s25   ;;  %s2269_s24 = sphi %s2324_s24, %s2839_s24   ;;  %s2265_s23 = sphi %s2322_s23, %s2838_s23   ;;  %s2261_s22 = sphi %s2320_s22, %s2837_s22   ;;  %s2257_s21 = sphi %s2318_s21, %s2836_s21  }
   0x5   : > { %s31_s29 = sadd.s32 1, %s2273_s25  ;;  %s178_s30 = sadd.s32 1, %s2265_s23 }
   0x6   : > { %p33_p0 = scmp.ge.s32.totalorder %s31_s29, 2  ;;  %p188_p1 = scmp.ne.s32.totalorder %s2265_s23, %s2261_s22 }
   0x7   : > { %p189_p2 = scmp.eq.s32.totalorder %s1740_s27, 1  ;;  %p194_p3 = scmp.ne.s32.totalorder %s2261_s22, %s2257_s21 }
   0x8   : > { %s2842_s29 = smov (%p33_p0, %s31_s29), 0  ;;  %p195_p5 = scmp.eq.s32.totalorder %s1741_s28, 1 }
   0x9   : > { %p2358_p4 = por %p189_p2, %p188_p1  ;;  %s173_s8 = ssub.s32 %s2273_s25, %s2842_s29 }
   0xa   : > { %p1744_p6 = scmp.ge.s32.totalorder %s2277_s26, 1  ;;  %p176_p7 = scmp.eq.s32.totalorder %s173_s8, 0 }
   0xb   : > { %p2365_p8 = por %p195_p5, %p194_p3  ;;  %p243_p9 = scmp.lt.s32.totalorder %s2277_s26, 3 }
   0xc   : > { %s2371_s10 = scalar_select %p176_p7, %s2265_s23, %s178_s30  }
   0xd   : > { %p244_p10 = pnand %p1744_p6, %p243_p9 }
   0xe   : > { %p280_p11 = scmp.lt.s32.totalorder (!%p244_p10), %s2269_s24, 1  ;;  %s277_s19 = sand.u32 (!%p244_p10), 1, %s2261_s22  }
   0xf   : > { %247 = sbr.rel (%p244_p10) target bundleno = 712 (0x2c8), region = 44  ;;  %s1745_s27 = sshll.u32 (!%p244_p10), %s277_s19, 3 }
  0x10   : > { %s279_s30 = scalar_lea.vmem (!%p244_p10), [#allocation2], %s1745_s27  ;;  %s1640_s16 = scalar_lea.sflag (!%p244_p10), [#allocation3], %s277_s19 }
  0x11   : > { %s1654_s12 = sshll.u32 (!%p244_p10), %s279_s30, 4  ;;  %s2778_s12 = int_to_ptr.vmem [resolvable:$true] %s1654_s12 }
  0x14   : > { %v2075_v0 = vld [vmem:[%s2828_s1 + $0xdc] ss:$36 sps:$4 sm:$0xff]   ;;  %v2279_v2 = vmov 0   ;;  %v2078_v3 = vld [vmem:[%s2828_s1 + $0xe4] ss:$36 sps:$4 sm:$0xff]   ;;  %s2396_s11 = scalar_select %p280_p11, %s2269_s24, 1 }
  0x15   : > { %v2077_v1 = vld [vmem:[%s2828_s1 + $0xd8] ss:$36 sps:$4 sm:$0xff]   ;;  %603 = vmatprep.mubr.bf16.mxu0 %v2279_v2  ;;  %644 = vmatprep.mubr.bf16.mxu1 %v2279_v2  ;;  %v2080_v4 = vld [vmem:[%s2828_s1 + $0xe0] ss:$36 sps:$4 sm:$0xff]   ;;  %v2083_v6 = vld [vmem:[%s2828_s1 + $0x90] ss:$36 sps:$4 sm:$0xff]  }
  0x16   : > { %579 = vmatprep.subr.bf16.mxu0 %v2075_v0  ;;  %v2081_v5 = vld [vmem:[%s2828_s1 + $0x94] ss:$36 sps:$4 sm:$0xff]   ;;  %620 = vmatprep.subr.bf16.mxu1 %v2078_v3  ;;  %v2084_v7 = vld [vmem:[%s2828_s1 + $0x9c] ss:$36 sps:$4 sm:$0xff]   ;;  %v2087_v9 = vld [vmem:[%s2828_s1 + $0x4c] ss:$36 sps:$4 sm:$0xff]  }
  0x17   : > { %580 = vmatpush1.bf16.msra.mxu0 %v2077_v1  ;;  %621 = vmatpush1.bf16.msra.mxu1 %v2080_v4  ;;  %v2086_v8 = vld [vmem:[%s2828_s1 + $0x98] ss:$36 sps:$4 sm:$0xff]   ;;  %v2089_v10 = vld [vmem:[%s2828_s1 + $0x48] ss:$36 sps:$4 sm:$0xff]   ;;  %s1746_s28 = sshll.u32 %s2396_s11, 2  ;;  %vm567_vm0 = vcmask 523264  }
  0x18   : > { %581 = vmatprep.subr.bf16.mxu0 %v2081_v5  ;;  %622 = vmatprep.subr.bf16.mxu1 %v2084_v7  ;;  %v2090_v11 = vld [vmem:[%s2828_s1 + $0x54] ss:$36 sps:$4 sm:$0xff]   ;;  %v2093_v12 = vld [vmem:[%s2828_s1 + $0x4] ss:$36 sps:$4 sm:$0xff]   ;;  %v2096_v14 = vld [vmem:[%s2828_s1 + $0xc] ss:$36 sps:$4 sm:$0xff]   ;;  %s283_s18 = scalar_lea.vmem %s2827_s0, %s1746_s28 }
  0x19   : > { %v2092_v13 = vld [vmem:[%s2828_s1 + $0x50] ss:$36 sps:$4 sm:$0xff]   ;;  %v2095_v15 = vld [vmem:[%s2828_s1] ss:$36 sps:$4 sm:$0xff]   ;;  %v2098_v17 = vld [vmem:[%s2828_s1 + $0x8] ss:$36 sps:$4 sm:$0xff]  }
  0x1a   : > { %v2101_v16 = vld [vmem:[%s2828_s1 + $0xec] ss:$36 sps:$4 sm:$0xff]   ;;  %v2432_v18 = vld [vmem:[%s283_s18] sm:$0xf]  ;;  %v2107_v19 = vld [vmem:[%s2828_s1 + $0xf4] ss:$36 sps:$4 sm:$0xff]  }
  0x1b   : > { %582 = vmatpush1.bf16.msra.mxu0 %v2083_v6  ;;  %623 = vmatpush1.bf16.msra.mxu1 %v2086_v8  ;;  %v2099_v20 = vld [vmem:[%s2828_s1 + $0xe8] ss:$36 sps:$4 sm:$0xff]   ;;  %v2105_v22 = vld [vmem:[%s2828_s1 + $0xf0] ss:$36 sps:$4 sm:$0xff]   ;;  %v2102_v24 = vld [vmem:[%s2828_s1 + $0xa0] ss:$36 sps:$4 sm:$0xff]  }
  0x1c   : > { %583 = vmatprep.subr.bf16.mxu0 %v2087_v9  ;;  %624 = vmatprep.subr.bf16.mxu1 %v2090_v11  ;;  %v2104_v21 = vld [vmem:[%s2828_s1 + $0xa4] ss:$36 sps:$4 sm:$0xff]   ;;  %v2113_v23 = vld [vmem:[%s2828_s1 + $0xac] ss:$36 sps:$4 sm:$0xff]   ;;  %v2110_v25 = vld [vmem:[%s2828_s1 + $0x5c] ss:$36 sps:$4 sm:$0xff]   ;;  %v338_v9 = vlaneseq }
  0x1d   : > { %v2111_v26 = vld [vmem:[%s2828_s1 + $0xa8] ss:$36 sps:$4 sm:$0xff]   ;;  %v2108_v28 = vld [vmem:[%s2828_s1 + $0x58] ss:$36 sps:$4 sm:$0xff]   ;;  %v2117_v30 = vld [vmem:[%s2828_s1 + $0x60] ss:$36 sps:$4 sm:$0xff]  }
  0x1e   : > { %v2119_v27 = vld [vmem:[%s2828_s1 + $0x64] ss:$36 sps:$4 sm:$0xff]   ;;  %v2116_v29 = vld [vmem:[%s2828_s1 + $0x14] ss:$36 sps:$4 sm:$0xff]   ;;  %v2122_v31 = vld [vmem:[%s2828_s1 + $0x1c] ss:$36 sps:$4 sm:$0xff]  }
  0x1f   : > { %584 = vmatpush1.bf16.msra.mxu0 %v2089_v10  ;;  %625 = vmatpush1.bf16.msra.mxu1 %v2092_v13  ;;  %v2114_v32 = vld [vmem:[%s2828_s1 + $0x10] ss:$36 sps:$4 sm:$0xff]   ;;  %v2120_v33 = vld [vmem:[%s2828_s1 + $0x18] ss:$36 sps:$4 sm:$0xff]   ;;  %v2280_v36 = vmov 0.0   ;;  %vm2281_vm1 = vmmov 0  }
  0x20   : > { %585 = vmatprep.subr.bf16.mxu0 %v2093_v12  ;;  %626 = vmatprep.subr.bf16.mxu1 %v2096_v14  ;;  %v2127_v34 = vld [vmem:[%s2830_s3 + $0x78] sm:$0xff]   ;;  %v2131_v38 = vld [vmem:[%s2830_s3 + $0x70] sm:$0xff]   ;;  %v2135_v41 = vld [vmem:[%s2830_s3 + $0x68] sm:$0xff]   ;;  %s1871_s20 = sshll.u32 %s2396_s11, 4  ;;  %v2617_v10 = vshrl.u32 %v338_v9, 7  ;;  %vm1594_vm2 = vcmask 261120  }
  0x21   : > { %v2123_v35 = vld [vmem:[%s2828_s1 + $0xf8] ss:$36 sps:$4 sm:$0xff]   ;;  %v2124_v39 = vld [vmem:[%s2828_s1 + $0xb0] ss:$36 sps:$4 sm:$0xff]   ;;  %v2125_v42 = vld [vmem:[%s2828_s1 + $0x68] ss:$36 sps:$4 sm:$0xff]   ;;  %s2585_s8 = scalar_lea.vmem %s2832_s5, %s1871_s20 }
  0x22   : > { %v2128_v37 = vld [vmem:[%s2830_s3 + $0x38] sm:$0xff]   ;;  %v2132_v40 = vld [vmem:[%s2830_s3 + $0x30] sm:$0xff]   ;;  %v2136_v43 = vld [vmem:[%s2830_s3 + $0x28] sm:$0xff]   ;;  %v340_v11 = vsub.s32 0, %v2617_v10  ;;  %v344_v13 = vsub.s32 1, %v2617_v10  ;;  %v348_v14 = vsub.s32 2, %v2617_v10 }
  0x23   : > { %586 = vmatpush1.bf16.msra.mxu0 %v2095_v15  ;;  %627 = vmatpush1.bf16.msra.mxu1 %v2098_v17  ;;  %v2139_v44 = vld [vmem:[%s2830_s3 + $0x60] sm:$0xff]   ;;  %v2129_v46 = vld [vmem:[%s2830_s3 + $0xf8] sm:$0xff]   ;;  %v2133_v50 = vld [vmem:[%s2830_s3 + $0xf0] sm:$0xff]   ;;  %s1868_s28 = sshll.u32 %s2269_s24, 7  ;;  %s2201_s11 = scalar_lea.vmem %s2778_s12, 128 }
  0x24   : > { %661 = vmatprep.subr.bf16.mxu0 %v2101_v16  ;;  %702 = vmatprep.subr.bf16.mxu1 %v2107_v19  ;;  %v2126_v45 = vld [vmem:[%s2828_s1 + $0x20] ss:$36 sps:$4 sm:$0xff]   ;;  %v2130_v47 = vld [vmem:[%s2830_s3 + $0xb8] sm:$0xff]   ;;  %v2147_v52 = vld [vmem:[%s2830_s3 + $0x50] sm:$0xff]   ;;  %v352_v16 = vsub.s32 3, %v2617_v10  ;;  %s2783_s15 = scalar_lea.hbm %s2833_s6, %s1868_s28  ;;  %p2202_p12 = scmp.ne.s32.totalorder %s2778_s12, %s2201_s11 }
  0x25   : > { %v2140_v48 = vld [vmem:[%s2830_s3 + $0x20] sm:$0xff]   ;;  %v2143_v49 = vld [vmem:[%s2830_s3 + $0x58] sm:$0xff]   ;;  %v2134_v53 = vld [vmem:[%s2830_s3 + $0xb0] sm:$0xff]   ;;  %s2282_s24 = smov [#allocation2]  }
  0x26   : > { %1786 = vmatmul.mubr.msk.bf16.vlgmr.msra.gmra.mxu0 %vm567_vm0, %v2432_v18  ;;  %1787 = vmatmul.mubr.msk.bf16.vlgmr.msra.gmra.mxu1 %vm567_vm0, %v2432_v18  ;;  %v2144_v51 = vld [vmem:[%s2830_s3 + $0x18] sm:$0xff]   ;;  %v2137_v54 = vld [vmem:[%s2830_s3 + $0xe8] sm:$0xff]   ;;  %v2148_v55 = vld [vmem:[%s2830_s3 + $0x10] sm:$0xff]   ;;  %p2203_p13 = pnand %p2202_p12, %p2358_p4  ;;  %s2205_s17 = sshll.u32 %s2282_s24, 4  ;;  %s2206_s17 = int_to_ptr.vmem [resolvable:$false] %s2205_s17 }
  0x27   : > { %662 = vmatpush1.bf16.msra.mxu0 %v2099_v20  ;;  %685 = vmatprep.mubr.bf16.mxu0 %v2279_v2  ;;  %v2138_v56 = vld [vmem:[%s2830_s3 + $0xa8] sm:$0xff]   ;;  %v2141_v57 = vld [vmem:[%s2830_s3 + $0xe0] sm:$0xff]   ;;  %v2145_v59 = vld [vmem:[%s2830_s3 + $0xd8] sm:$0xff]   ;;  %s2207_s20 = scalar_lea.vmem %s2206_s17, 256  ;;  %p2208_p1 = scmp.lt.s32.totalorder %s2778_s12, %s2206_s17 }
  0x28   : > { %663 = vmatprep.subr.bf16.mxu0 %v2104_v21  ;;  %703 = vmatpush1.bf16.msra.mxu1 %v2105_v22  ;;  %v2142_v58 = vld [vmem:[%s2830_s3 + $0xa0] sm:$0xff]   ;;  %v2146_v60 = vld [vmem:[%s2830_s3 + $0x98] sm:$0xff]   ;;  %v2149_v61 = vld [vmem:[%s2830_s3 + $0xd0] sm:$0xff]   ;;  %p2204_p0 = pneg %p2203_p13  ;;  %p2209_p2 = scmp.lt.s32.totalorder %s2207_s20, %s2201_s11 }
  0x29   : > { %726 = vmatprep.mubr.bf16.mxu1 %v2279_v2  ;;  %704 = vmatprep.subr.bf16.mxu1 %v2113_v23  ;;  %v2150_v62 = vld [vmem:[%s2830_s3 + $0x90] sm:$0xff]   ;;  %v2151_v63 = vld [vmem:[%s2830_s3 + $0x48] sm:$0xff]   ;;  %v2155_v3 = vld [vmem:[%s2830_s3 + $0x40] sm:$0xff]  }
  0x2a   : > { %v2152_v0 = vld [vmem:[%s2830_s3 + $0x8] sm:$0xff]   ;;  %v2156_v4 = vld [vmem:[%s2830_s3] sm:$0xff]   ;;  %v2159_v7 = vld [vmem:[%s2830_s3 + $0x178] sm:$0xff]   ;;  %p2210_p3 = por %p2209_p2, %p2208_p1 }
  0x2b   : > { %664 = vmatpush1.bf16.msra.mxu0 %v2102_v24  ;;  %v2153_v1 = vld [vmem:[%s2830_s3 + $0xc8] sm:$0xff]   ;;  %v2157_v5 = vld [vmem:[%s2830_s3 + $0xc0] sm:$0xff]   ;;  %v2161_v8 = vld [vmem:[%s2830_s3 + $0x1f8] sm:$0xff]  }
  0x2c   : > { %665 = vmatprep.subr.bf16.mxu0 %v2110_v25  ;;  %705 = vmatpush1.bf16.msra.mxu1 %v2111_v26  ;;  %v2154_v2 = vld [vmem:[%s2830_s3 + $0x88] sm:$0xff]   ;;  %v2158_v6 = vld [vmem:[%s2830_s3 + $0x80] sm:$0xff]   ;;  %p2211_p5 = pnand %p2210_p3, %p2204_p0 }
  0x2d   : > { %706 = vmatprep.subr.bf16.mxu1 %v2119_v27  ;;  %v2623_v12 = vld [vmem:[%s2829_s2] sm:$0xff] }
  0x2e   : > { %v341_v15 = vrot.slane %v2623_v12, %v340_v11  ;;  %v345_v17 = vrot.slane %v2623_v12, %v344_v13  ;;  %v353_v21 = vrot.slane %v2623_v12, %v352_v16  ;;  %v356_v11 = vsub.s32 4, %v2617_v10  ;;  %v2179_v13 = vld [vmem:[%s2830_s3 + $0x150] sm:$0xff]   ;;  %v2178_v16 = vld [vmem:[%s2830_s3 + $0x198] sm:$0xff]  }
  0x2f   : > { %666 = vmatpush1.bf16.msra.mxu0 %v2108_v28 }
  0x30   : > { %667 = vmatprep.subr.bf16.mxu0 %v2116_v29  ;;  %707 = vmatpush1.bf16.msra.mxu1 %v2117_v30 }
  0x31   : > { %708 = vmatprep.subr.bf16.mxu1 %v2122_v31 }
  0x33   : > { %668 = vmatpush1.bf16.msra.mxu0 %v2114_v32 }
  0x34   : > { %1977 = vmatprep.subr.bf16.mxu0 %v2280_v36  ;;  %709 = vmatpush1.bf16.msra.mxu1 %v2120_v33 }
  0x35   : > { %1877 = vmatprep.subr.bf16.mxu1 %v2127_v34 }
  0x36   : > { %1788 = vmatmul.mubr.msk.bf16.vlgmr.msra.gmra.mxu0 %vm567_vm0, %v2432_v18 }
  0x37   : > { %1978 = vmatpush3.bf16.msra.mxu0 %v2123_v35  ;;  %1985 = vmatprep.mubr.msk.bf16.mxu0 %vm2281_vm1, %v2280_v36 }
  0x38   : > { %1789 = vmatmul.mubr.msk.bf16.vlgmr.msra.gmra.mxu1 %vm567_vm0, %v2432_v18  ;;  %1979 = vmatprep.subr.bf16.mxu0 %v2280_v36 }
  0x39   : > { %1878 = vmatpush3.bf16.msra.mxu1 %v2128_v37  ;;  %v2160_v37 = vld [vmem:[%s2830_s3 + $0x138] sm:$0xff]  }
  0x3a   : > { %1879 = vmatprep.subr.bf16.mxu1 %v2131_v38 }
  0x3b   : > { %1980 = vmatpush3.bf16.msra.mxu0 %v2124_v39 }
  0x3c   : > { %1981 = vmatprep.subr.bf16.mxu0 %v2280_v36 }
  0x3d   : > { %1880 = vmatpush3.bf16.msra.mxu1 %v2132_v40  ;;  %v2163_v40 = vld [vmem:[%s2830_s3 + $0x170] sm:$0xff]  }
  0x3e   : > { %1881 = vmatprep.subr.bf16.mxu1 %v2135_v41 }
  0x3f   : > { %1982 = vmatpush3.bf16.msra.mxu0 %v2125_v42 }
  0x40   : > { %1983 = vmatprep.subr.bf16.mxu0 %v2280_v36 }
  0x41   : > { %1882 = vmatpush3.bf16.msra.mxu1 %v2136_v43  ;;  %v2162_v43 = vld [vmem:[%s2830_s3 + $0x1b8] sm:$0xff]  }
  0x42   : > { %1883 = vmatprep.subr.bf16.mxu1 %v2139_v44  ;;  %v2165_v44 = vld [vmem:[%s2830_s3 + $0x1f0] sm:$0xff]  }
  0x43   : > { %1984 = vmatpush3.bf16.msra.mxu0 %v2126_v45  ;;  %v2164_v45 = vld [vmem:[%s2830_s3 + $0x130] sm:$0xff]  }
  0x44   : > { %1899 = vmatprep.subr.bf16.mxu0 %v2129_v46  ;;  %v360_v46 = vsub.s32 5, %v2617_v10 }
  0x45   : > { %1884 = vmatpush3.bf16.msra.mxu1 %v2140_v48  ;;  %v2166_v48 = vld [vmem:[%s2830_s3 + $0x1b0] sm:$0xff]  }
  0x46   : > { %1986 = vmatmul.mubr.msk.bf16.vlgmr.msra.gmra.mxu0 %vm567_vm0, %v2432_v18  ;;  %1885 = vmatprep.subr.bf16.mxu1 %v2143_v49  ;;  %v349_v18 = vrot.slane %v2623_v12, %v348_v14  ;;  %v368_v49 = vsub.s32 7, %v2617_v10  ;;  %v364_v14 = vsub.s32 6, %v2617_v10  ;;  %v357_v10 = vrot.slane %v2623_v12, %v356_v11 }
  0x47   : > { %1900 = vmatpush3.bf16.msra.mxu0 %v2130_v47  ;;  %v2167_v47 = vld [vmem:[%s2830_s3 + $0x168] sm:$0xff]  }
  0x48   : > { %1901 = vmatprep.subr.bf16.mxu0 %v2133_v50  ;;  %v2169_v50 = vld [vmem:[%s2830_s3 + $0x1e8] sm:$0xff]  }
  0x49   : > { %1886 = vmatpush3.bf16.msra.mxu1 %v2144_v51  ;;  %v2168_v51 = vld [vmem:[%s2830_s3 + $0x128] sm:$0xff]  }
  0x4a   : > { %1887 = vmatprep.subr.bf16.mxu1 %v2147_v52  ;;  %v361_v52 = vrot.slane %v2623_v12, %v360_v46  ;;  %v2196_v46 = vld [vmem:[%s2830_s3 + $0x210] sm:$0xff]  }
  0x4b   : > { %1902 = vmatpush3.bf16.msra.mxu0 %v2134_v53  ;;  %v2171_v53 = vld [vmem:[%s2830_s3 + $0x160] sm:$0xff]  }
  0x4c   : > { %1903 = vmatprep.subr.bf16.mxu0 %v2137_v54 }
  0x4d   : > { %1888 = vmatpush3.bf16.msra.mxu1 %v2148_v55  ;;  %v2170_v55 = vld [vmem:[%s2830_s3 + $0x1a8] sm:$0xff]  }
  0x4e   : > { %1889 = vmatprep.subr.bf16.mxu1 %v2151_v63 }
  0x4f   : > { %1904 = vmatpush3.bf16.msra.mxu0 %v2138_v56  ;;  %v369_v56 = vrot.slane %v2623_v12, %v368_v49 }
  0x50   : > { %1905 = vmatprep.subr.bf16.mxu0 %v2141_v57  ;;  %v2173_v57 = vld [vmem:[%s2830_s3 + $0x1e0] sm:$0xff]  }
  0x51   : > { %1890 = vmatpush3.bf16.msra.mxu1 %v2152_v0 }
  0x52   : > { %1891 = vmatprep.subr.bf16.mxu1 %v2155_v3 }
  0x53   : > { %1906 = vmatpush3.bf16.msra.mxu0 %v2142_v58 }
  0x54   : > { %1907 = vmatprep.subr.bf16.mxu0 %v2145_v59 }
  0x55   : > { %1892 = vmatpush3.bf16.msra.mxu1 %v2156_v4  ;;  %v2177_v4 = vld [vmem:[%s2830_s3 + $0x1d8] sm:$0xff]  }
  0x56   : > { %1921 = vmatprep.subr.bf16.mxu1 %v2159_v7  ;;  %v2176_v7 = vld [vmem:[%s2830_s3 + $0x118] sm:$0xff]  }
  0x57   : > { %1908 = vmatpush3.bf16.msra.mxu0 %v2146_v60  ;;  %v2172_v60 = vld [vmem:[%s2830_s3 + $0x120] sm:$0xff]  }
  0x58   : > { %1909 = vmatprep.subr.bf16.mxu0 %v2149_v61 }
  0x5b   : > { %1910 = vmatpush3.bf16.msra.mxu0 %v2150_v62  ;;  %v2175_v62 = vld [vmem:[%s2830_s3 + $0x158] sm:$0xff]  }
  0x5c   : > { %1911 = vmatprep.subr.bf16.mxu0 %v2153_v1  ;;  %v2174_v1 = vld [vmem:[%s2830_s3 + $0x1a0] sm:$0xff]  }
  0x5f   : > { %1912 = vmatpush3.bf16.msra.mxu0 %v2154_v2 }
  0x60   : > { %1913 = vmatprep.subr.bf16.mxu0 %v2157_v5 }
  0x63   : > { %1914 = vmatpush3.bf16.msra.mxu0 %v2158_v6 }
  0x64   : > { %1943 = vmatprep.subr.bf16.mxu0 %v2161_v8 }
  0xe6   : > { %v605_v19 = vpop.f32.mrf.mxu0  ;;  %v646_v23 = vpop.f32.mrf.mxu1 }
  0xe7   : > { %v606_v20 = vadd.f32 %v605_v19, %v341_v15  ;;  %v647_v25 = vadd.f32 %v646_v23, %v349_v18  ;;  %v2181_v18 = vld [vmem:[%s2830_s3 + $0x1d0] sm:$0xff]   ;;  %v2185_v23 = vld [vmem:[%s2830_s3 + $0x1c8] sm:$0xff]  }
  0xe8   : > { %v607_v22 = vpop.f32.mrf.mxu0  ;;  %v648_v28 = vpop.f32.mrf.mxu1  ;;  %v2180_v19 = vld [vmem:[%s2830_s3 + $0x110] sm:$0xff]  }
  0xe9   : > { %v608_v24 = vadd.f32 %v607_v22, %v345_v17  ;;  %v775_v26 = vmax.f32 %v606_v20, 0.0  ;;  %v777_v30 = vmax.f32 %v647_v25, 0.0  ;;  %v649_v31 = vadd.f32 %v648_v28, %v353_v21  ;;  %v2183_v21 = vld [vmem:[%s2830_s3 + $0x148] sm:$0xff]   ;;  %v2182_v22 = vld [vmem:[%s2830_s3 + $0x190] sm:$0xff]  }
  0xea   : > { %v609_v27 = vpop.f32.mrf.mxu0  ;;  %v650_v33 = vpop.f32.mrf.mxu1  ;;  %v365_v20 = vrot.slane %v2623_v12, %v364_v14  ;;  %v2186_v28 = vld [vmem:[%s2830_s3 + $0x188] sm:$0xff]  }
  0xeb   : > { %v776_v29 = vmax.f32 %v608_v24, 0.0  ;;  %v778_v35 = vmax.f32 %v649_v31, 0.0  ;;  %v784_v38 = vpack.c.bf16 %v775_v26, %v775_v26  ;;  %v786_v39 = vpack.c.bf16 %v777_v30, %v777_v30  ;;  %v2184_v24 = vld [vmem:[%s2830_s3 + $0x108] sm:$0xff]   ;;  %v2187_v26 = vld [vmem:[%s2830_s3 + $0x140] sm:$0xff]  }
  0xec   : > { %v610_v32 = vpop.f32.mrf.mxu0  ;;  %v651_v41 = vpop.f32.mrf.mxu1  ;;  %v2188_v31 = vld [vmem:[%s2830_s3 + $0x100] sm:$0xff]  }
  0xed   : > { %v785_v34 = vpack.c.bf16 %v776_v29, %v776_v29  ;;  %v787_v42 = vpack.c.bf16 %v778_v35, %v778_v35  ;;  %v2189_v29 = vld [vmem:[%s2830_s3 + $0x1c0] sm:$0xff]   ;;  %v2192_v41 = vld [vmem:[%s2830_s3 + $0x230] sm:$0xff]  }
  0xee   : > { %v2190_v35 = vld [vmem:[%s2830_s3 + $0x180] sm:$0xff]  }
  0xef   : > { %1408 = vmatprep.mubr.bf16.mxu1 %v785_v34  ;;  %1448 = vmatprep.mubr.bf16.mxu0 %v787_v42  ;;  %v2193_v42 = vld [vmem:[%s2830_s3 + $0x228] sm:$0xff]  }
  0xf0   : > { %1409 = vmatmul.mubr.bf16.vlgmr.msra.gmra.mxu1 %v784_v38  ;;  %1449 = vmatmul.mubr.bf16.vlgmr.msra.gmra.mxu0 %v786_v39  ;;  %v2191_v38 = vld [vmem:[%s2830_s3 + $0x238] sm:$0xff]  }
  0xf1   : > { %1922 = vmatpush3.bf16.msra.mxu1 %v2160_v37  ;;  %1944 = vmatpush3.bf16.msra.mxu0 %v2162_v43  ;;  %v2194_v43 = vld [vmem:[%s2830_s3 + $0x220] sm:$0xff]  }
  0xf2   : > { %1923 = vmatprep.subr.bf16.mxu1 %v2163_v40  ;;  %1945 = vmatprep.subr.bf16.mxu0 %v2165_v44  ;;  %v2195_v44 = vld [vmem:[%s2830_s3 + $0x218] sm:$0xff]  }
  0xf5   : > { %1924 = vmatpush3.bf16.msra.mxu1 %v2164_v45  ;;  %1946 = vmatpush3.bf16.msra.mxu0 %v2166_v48  ;;  %v1749_v45 = vld [vmem:[%s2829_s2 + $0x8] ss:$0 sm:$0xff] }
  0xf6   : > { %1925 = vmatprep.subr.bf16.mxu1 %v2167_v47  ;;  %v687_v54 = vpop.f32.mrf.mxu0  ;;  %1947 = vmatprep.subr.bf16.mxu0 %v2169_v50  ;;  %v2197_v48 = vld [vmem:[%s2830_s3 + $0x208] sm:$0xff]   ;;  %v2198_v50 = vld [vmem:[%s2830_s3 + $0x200] sm:$0xff]  }
  0xf7   : > { %v688_v12 = vadd.f32 %v687_v54, %v357_v10 }
  0xf8   : > { %v689_v58 = vpop.f32.mrf.mxu0  ;;  %v728_v59 = vpop.f32.mrf.mxu1 }
  0xf9   : > { %1926 = vmatpush3.bf16.msra.mxu1 %v2168_v51  ;;  %v690_v61 = vadd.f32 %v689_v58, %v361_v52  ;;  %1948 = vmatpush3.bf16.msra.mxu0 %v2170_v55  ;;  %v729_v25 = vadd.f32 %v728_v59, %v365_v20  ;;  %v779_v32 = vmax.f32 %v688_v12, 0.0  ;;  %v2199_v52 = vld [vmem:[%s2585_s8 + $0x8] sm:$0xff]  }
  0xfa   : > { %1927 = vmatprep.subr.bf16.mxu1 %v2171_v53  ;;  %v691_v63 = vpop.f32.mrf.mxu0  ;;  %v730_v0 = vpop.f32.mrf.mxu1  ;;  %1949 = vmatprep.subr.bf16.mxu0 %v2173_v57  ;;  %v2200_v53 = vld [vmem:[%s2585_s8] sm:$0xff]  }
  0xfb   : > { %v780_v2 = vmax.f32 %v690_v61, 0.0  ;;  %v731_v3 = vadd.f32 %v730_v0, %v369_v56  ;;  %v781_v33 = vmax.f32 %v729_v25, 0.0  ;;  %v788_v39 = vpack.c.bf16 %v779_v32, %v779_v32 }
  0xfc   : > { %v692_v5 = vpop.f32.mrf.mxu0  ;;  %v732_v6 = vpop.f32.mrf.mxu1 }
  0xfd   : > { %1928 = vmatpush3.bf16.msra.mxu1 %v2172_v60  ;;  %v789_v8 = vpack.c.bf16 %v780_v2, %v780_v2  ;;  %v782_v9 = vmax.f32 %v731_v3, 0.0  ;;  %1950 = vmatpush3.bf16.msra.mxu0 %v2174_v1  ;;  %v790_v40 = vpack.c.bf16 %v781_v33, %v781_v33 }
  0xfe   : > { %1929 = vmatprep.subr.bf16.mxu1 %v2175_v62  ;;  %v733_v15 = vpop.f32.mrf.mxu1  ;;  %1951 = vmatprep.subr.bf16.mxu0 %v2177_v4 }
  0xff   : > { %v791_v17 = vpack.c.bf16 %v782_v9, %v782_v9  ;;  %1488 = vmatprep.mubr.bf16.mxu1 %v789_v8 }
 0x101   : > { %1930 = vmatpush3.bf16.msra.mxu1 %v2176_v7  ;;  %1528 = vmatprep.mubr.bf16.mxu0 %v791_v17 }
 0x102   : > { %1931 = vmatprep.subr.bf16.mxu1 %v2179_v13  ;;  %1952 = vmatpush3.bf16.msra.mxu0 %v2178_v16 }
 0x103   : > { %1953 = vmatprep.subr.bf16.mxu0 %v2181_v18 }
 0x105   : > { %1932 = vmatpush3.bf16.msra.mxu1 %v2180_v19 }
 0x106   : > { %1933 = vmatprep.subr.bf16.mxu1 %v2183_v21  ;;  %v769_v27 = vpop.f32.mrf.mxu0  ;;  %1954 = vmatpush3.bf16.msra.mxu0 %v2182_v22 }
 0x107   : > { %1955 = vmatprep.subr.bf16.mxu0 %v2185_v23  ;;  %v770_v47 = vadd.f32 %v1749_v45, %v769_v27 }
 0x108   : > { %v1987_v30 = vpop.f32.mrf.mxu0 }
 0x109   : > { %1934 = vmatpush3.bf16.msra.mxu1 %v2184_v24  ;;  %v783_v49 = vmax.f32 %v770_v47, 0.0 }
 0x10a   : > { %1935 = vmatprep.subr.bf16.mxu1 %v2187_v26  ;;  %v772_v34 = vpop.f32.mrf.mxu0  ;;  %1956 = vmatpush3.bf16.msra.mxu0 %v2186_v28 }
 0x10b   : > { %1957 = vmatprep.subr.bf16.mxu0 %v2189_v29  ;;  %v792_v51 = vpack.c.bf16 %v783_v49, %v783_v49 }
 0x10c   : > { %v1988_v37 = vpop.f32.mrf.mxu0 }
 0x10d   : > { %1936 = vmatpush3.bf16.msra.mxu1 %v2188_v31 }
 0x10e   : > { %1989 = vmatprep.subr.bf16.mxu1 %v2280_v36  ;;  %1958 = vmatpush3.bf16.msra.mxu0 %v2190_v35 }
 0x10f   : > { %2009 = vmatprep.subr.bf16.mxu0 %v2280_v36 }
 0x110   : > { %1489 = vmatmul.mubr.bf16.vlgmr.msra.gmra.mxu1 %v788_v39 }
 0x111   : > { %1990 = vmatpush3.bf16.msra.mxu1 %v2191_v38  ;;  %2005 = vmatprep.mubr.msk.bf16.mxu1 %vm2281_vm1, %v2280_v36 }
 0x112   : > { %1529 = vmatmul.mubr.bf16.vlgmr.msra.gmra.mxu0 %v790_v40  ;;  %1991 = vmatprep.subr.bf16.mxu1 %v2280_v36 }
 0x113   : > { %2013 = vmatprep.mubr.msk.bf16.mxu0 %vm2281_vm1, %v2280_v36  ;;  %2010 = vmatpush3.bf16.msra.mxu0 %v2199_v52 }
 0x114   : > { %2011 = vmatprep.subr.bf16.mxu0 %v2280_v36 }
 0x115   : > { %1992 = vmatpush3.bf16.msra.mxu1 %v2192_v41 }
 0x116   : > { %1993 = vmatprep.subr.bf16.mxu1 %v2280_v36 }
 0x117   : > { %2012 = vmatpush3.bf16.msra.mxu0 %v2200_v53 }
 0x119   : > { %1994 = vmatpush3.bf16.msra.mxu1 %v2193_v42 }
 0x11a   : > { %1995 = vmatprep.subr.bf16.mxu1 %v2280_v36 }
 0x11d   : > { %1996 = vmatpush3.bf16.msra.mxu1 %v2194_v43 }
 0x11e   : > { %1997 = vmatprep.subr.bf16.mxu1 %v2280_v36 }
 0x121   : > { %1998 = vmatpush3.bf16.msra.mxu1 %v2195_v44 }
 0x122   : > { %1999 = vmatprep.subr.bf16.mxu1 %v2280_v36 }
 0x125   : > { %2000 = vmatpush3.bf16.msra.mxu1 %v2196_v46 }
 0x126   : > { %2001 = vmatprep.subr.bf16.mxu1 %v2280_v36 }
 0x129   : > { %2002 = vmatpush3.bf16.msra.mxu1 %v2197_v48 }
 0x12a   : > { %2003 = vmatprep.subr.bf16.mxu1 %v2280_v36  ;;  %v1791_v36 = vld [vmem:[%s2831_s4] ss:$0 sm:$0xff] }
 0x12d   : > { %2004 = vmatpush3.bf16.msra.mxu1 %v2198_v50 }
 0x130   : > { %2006 = vmatmul.mubr.bf16.vlgmr.msra.gmra.mxu1 %v792_v51 }
 0x1b0   : > { %v1893_v54 = vpop.f32.mrf.mxu1  ;;  %v1915_v56 = vpop.f32.mrf.mxu0 }
 0x1b2   : > { %v1894_v55 = vpop.f32.mrf.mxu1  ;;  %v1916_v58 = vpop.f32.mrf.mxu0 }
 0x1b3   : > { %v1895_v6 = vadd.f32 %v1894_v55, %v1893_v54  ;;  %v1917_v8 = vadd.f32 %v1916_v58, %v1915_v56 }
 0x1b4   : > { %v1896_v57 = vpop.f32.mrf.mxu1  ;;  %v1918_v60 = vpop.f32.mrf.mxu0 }
 0x1b5   : > { %v1411_v7 = vadd.f32 %v1895_v6, %v1791_v36 }
 0x1b6   : > { %v1897_v59 = vpop.f32.mrf.mxu1  ;;  %v1919_v61 = vpop.f32.mrf.mxu0 }
 0x1b7   : > { %v1451_v11 = vadd.f32 %v1917_v8, %v1411_v7 }
 0x1d0   : > { %v1937_v62 = vpop.f32.mrf.mxu1 }
 0x1d2   : > { %v1938_v63 = vpop.f32.mrf.mxu1  ;;  %v1959_v0 = vpop.f32.mrf.mxu0 }
 0x1d3   : > { %v1939_v9 = vadd.f32 %v1938_v63, %v1937_v62 }
 0x1d4   : > { %v1940_v1 = vpop.f32.mrf.mxu1  ;;  %v1960_v2 = vpop.f32.mrf.mxu0 }
 0x1d5   : > { %v1491_v13 = vadd.f32 %v1939_v9, %v1451_v11  ;;  %v1961_v14 = vadd.f32 %v1960_v2, %v1959_v0 }
 0x1d6   : > { %v1941_v3 = vpop.f32.mrf.mxu1  ;;  %v1962_v4 = vpop.f32.mrf.mxu0 }
 0x1d7   : > { %v1531_v15 = vadd.f32 %v1961_v14, %v1491_v13 }
 0x1d8   : > { %v1963_v5 = vpop.f32.mrf.mxu0 }
 0x1f0   : > { %v1570_v16 = vpop.f32.mrf.mxu1 }
 0x1f1   : > { %v1571_v17 = vadd.f32 %v1570_v16, %v1531_v15 }
 0x1f2   : > { %v2007_v18 = vpop.f32.mrf.mxu1 }
 0x1f3   : > { %v1576_v19 = vmax.f32 %v1571_v17, 0.0 }
 0x1f4   : > { %v1573_v10 = vpop.f32.mrf.mxu1 }
 0x1f5   : > { %v1577_v20 = vpack.c.bf16 %v1576_v19, %v1576_v19 }
 0x1f6   : > { %v2008_v21 = vpop.f32.mrf.mxu1 }
 0x1f7   : > { %2014 = vmatmul.mubr.msk.bf16.vlgmr.msra.gmra.mxu0 %vm1594_vm2, %v1577_v20 }
 0x2b7   : > { %v1632_v22 = vpop.f32.mrf.mxu0 }
 0x2b8   : > { %1638 = vst [vmem:[%s279_s30] sm:$0xff] %v1632_v22 }
 0x2b9   : > { %v2015_v23 = vpop.f32.mrf.mxu0 }
 0x2ba   : > { %2214 = shalt.err (!%p2211_p5)
}
 0x2bb   : > { %s2215_s18 = scalar_lea.hbm %s2783_s15, 128  ;;  %s2219_s27 = scalar_lea.hbm %s2833_s6, 256 }
 0x2bc   : > { %p2216_p6 = scmp.ne.s32.totalorder %s2783_s15, %s2215_s18  ;;  %p2220_p10 = scmp.lt.s32.totalorder %s2783_s15, %s2833_s6 }
 0x2bd   : > { %p2221_p11 = scmp.lt.s32.totalorder %s2219_s27, %s2215_s18 }
 0x2be   : > { %p2217_p7 = pnand %p2216_p6, %p2358_p4 }
 0x2bf   : > { %p2222_p12 = por %p2221_p11, %p2220_p10 }
 0x2c0   : > { %p2218_p9 = pneg %p2217_p7 }
 0x2c2   : > { %p2223_p13 = pnand %p2222_p12, %p2218_p9 }
 0x2c4   : > { %2226 = shalt.err (!%p2223_p13)
}
 0x2c5   : > { %2017 = dma.vmem_to_hbm [thread:$0]  (%p2358_p4), %s2778_s12, 128, %s2783_s15, %s1640_s16   ;;  %v1635_v24 = vpop.f32.mrf.mxu0 }
 0x2c7   : > { %v2016_v12 = vpop.f32.mrf.mxu0 }
 0x2c8 PF: > { %p2023_p0 = scmp.ge.s32.totalorder %s2277_s26, 2  ;;  %s1666_s13 = sand.u32 1, %s2257_s21  }
 0x2c9   : > { %s1667_s14 = scalar_lea.sflag [#allocation3], %s1666_s13 }
 0x2ca   : > { %p2020_p1 = pnand %p2023_p0, %p2365_p8 }
 0x2cc   : > { %p2021_p2 = pneg %p2020_p1 }
 0x2ce   : > { %2252 = dma.done.wait (%p2021_p2), %s1667_s14, 128  }
 0x2cf   : > { %2254 = vsyncadd (%p2021_p2), %s1667_s14, 4294967168  ;;  %s19_s26 = sadd.s32 1, %s2277_s26   ;;  %s2836_s21 = smov %s2261_s22 }
 0x2d0   : > { %p16_p3 = scmp.ge.s32.totalorder %s19_s26, 4   ;;  %s2837_s22 = smov %s2265_s23 }
 0x2d1   : > { %s2838_s23 = smov %s2371_s10  ;;  %s2839_s24 = smov %s2273_s25 }
 0x2d2   : > { %s2840_s25 = smov %s2842_s29  ;;  %18 = sbr.rel (!%p16_p3) target bundleno = 4 (0x4), region = 82 }
 0x2d7   :  { %1672 = vsyncpa [#allocation3], 1 }
 0x2d8   :  { %1674 = vsyncpa [#allocation3 + $0x1], 1 }

</bundles_post_ra>
